<compile_context>
chip_gen: v7x
topology: tpu7x:2x2x1
jax: 0.10.0
libtpu: 0.0.40
codegen_flags: <defaults>
</compile_context>

<pallas_src>
import functools

import jax
import jax.numpy as jnp
from jax import lax
from jax.experimental import pallas as pl
from jax.experimental.pallas import tpu as pltpu


# ------------------------------ fused kernel --------------------------------
def feedback_kernel(x_ref, yz_ref, lens_ref, wih_ref, whh_ref, b_ref, o_ref,
                    *, B, L, H):
    # x_ref   : (B, L*H)   f32  -- x with time flattened along lanes
    # yz_ref  : (L*B, 2D)  f32  -- [y | z] features, time-major rows (row = t*B + b)
    # lens_ref: (B, 1)     i32
    # wih_ref : (2D, 8H)   bf16 -- block-diag, gate-interleaved [i1 i2 f1 f2 g1 g2 o1 o2]
    # whh_ref : (2H, 8H)   bf16 -- block-diag, gate-interleaved
    # b_ref   : (1, 8H)    f32  -- [b_ih + b_hh] per LSTM, gate-interleaved
    # o_ref   : (B, L*H)   f32
    lens = lens_ref[...]                                      # (B, 1) int32

    # Lane-dense input projection: both LSTMs, every timestep, one MXU pass.
    yz = yz_ref[...].astype(jnp.bfloat16)
    xw = jnp.dot(yz, wih_ref[...], preferred_element_type=jnp.float32)
    xw = xw + b_ref[...]                                      # (L*B, 8H) f32
    whh = whh_ref[...]

    h = jnp.zeros((B, 2 * H), jnp.float32)                    # [h1 | h2]
    c = jnp.zeros((B, 2 * H), jnp.float32)
    chunks = []
    for t in range(L):                                        # L static -> fully unrolled
        gates = xw[t * B:(t + 1) * B, :] + jnp.dot(
            h.astype(jnp.bfloat16), whh, preferred_element_type=jnp.float32)
        i_g = jax.nn.sigmoid(gates[:, 0 * H:2 * H])           # (B, 2H) each
        f_g = jax.nn.sigmoid(gates[:, 2 * H:4 * H])
        g_g = jnp.tanh(gates[:, 4 * H:6 * H])
        o_g = jax.nn.sigmoid(gates[:, 6 * H:8 * H])
        c_new = f_g * c + i_g * g_g
        h_new = o_g * jnp.tanh(c_new)
        m = (t < lens).astype(jnp.float32)                    # (B, 1) valid-step mask
        h = m * h_new + (1.0 - m) * h                         # freeze state past length
        c = m * c_new + (1.0 - m) * c
        out_t = m * h                                         # padded steps -> 0 (packed seq)
        mask_t = 0.5 * (jax.nn.sigmoid(out_t[:, 0:H])
                        + jax.nn.sigmoid(out_t[:, H:2 * H]))  # (B, H)
        chunks.append(mask_t)

    mask_flat = jnp.concatenate(chunks, axis=-1)              # (B, L*H), lane-dense
    o_ref[...] = x_ref[...] * mask_flat                       # single lane-dense store


# ------------------------------ host wrapper ---------------------------------
def pack_lstm_pair(wih1, whh1, b1, wih2, whh2, b2):
    """Fuse two LSTMs into block-diagonal, gate-interleaved weights.

    Canonical per-LSTM layout (torch-like, pre-transposed): wih_k (D,4H),
    whh_k (H,4H), b_k (4H,) with gate column order [i f g o] and b_k = b_ih+b_hh.
    Packed column order: [i1 i2 f1 f2 g1 g2 o1 o2] (each block H wide).
    """
    D = wih1.shape[0]
    H = wih1.shape[1] // 4
    wih_big = jnp.zeros((2 * D, 8 * H), jnp.float32)
    whh_big = jnp.zeros((2 * H, 8 * H), jnp.float32)
    b_big = jnp.zeros((1, 8 * H), jnp.float32)
    for g in range(4):
        src = slice(g * H, (g + 1) * H)
        c1 = slice((2 * g) * H, (2 * g + 1) * H)
        c2 = slice((2 * g + 1) * H, (2 * g + 2) * H)
        wih_big = wih_big.at[:D, c1].set(wih1[:, src])
        wih_big = wih_big.at[D:, c2].set(wih2[:, src])
        whh_big = whh_big.at[:H, c1].set(whh1[:, src])
        whh_big = whh_big.at[H:, c2].set(whh2[:, src])
        b_big = b_big.at[0, c1].set(b1[src])
        b_big = b_big.at[0, c2].set(b2[src])
    return (wih_big.astype(jnp.bfloat16), whh_big.astype(jnp.bfloat16), b_big)


def feedback_unit(x, y, z, lengths, packed):
    B, L, M = x.shape
    D = y.shape[-1]
    H = M
    wih_big, whh_big, b_big = packed

    yz = jnp.concatenate([y, z], axis=-1)                          # (B, L, 2D)
    yz_tm = jnp.transpose(yz, (1, 0, 2)).reshape(L * B, 2 * D)     # time-major rows
    x_flat = x.reshape(B, L * M)                                   # lane-dense x / output
    lens2d = lengths.reshape(B, 1).astype(jnp.int32)

    kernel = functools.partial(feedback_kernel, B=B, L=L, H=H)

    def full(shape):
        return pl.BlockSpec(shape, lambda g, _s=shape: (0,) * len(_s))

    out_flat = pl.pallas_call(
        kernel,
        out_shape=jax.ShapeDtypeStruct((B, L * M), jnp.float32),
        grid=(1,),
        in_specs=[
            full((B, L * M)),          # x_flat
            full((L * B, 2 * D)),      # yz_tm
            full((B, 1)),              # lengths
            full((2 * D, 8 * H)),      # fused W_ih (bf16)
            full((2 * H, 8 * H)),      # fused W_hh (bf16)
            full((1, 8 * H)),          # fused bias
        ],
        out_specs=full((B, L * M)),
        compiler_params=pltpu.CompilerParams(
            dimension_semantics=("arbitrary",)),
    )(x_flat, yz_tm, lens2d, wih_big, whh_big, b_big)
    return out_flat.reshape(B, L, M)


# ---------------------------- pure-JAX reference -----------------------------
def reference_forward(x, y, z, lengths, raw):
    hp = lax.Precision.HIGHEST
    B, L, M = x.shape
    H = M

    def run_lstm(seq, wih, whh, b, length):
        xw = jnp.dot(seq, wih, precision=hp) + b          # (L, 4H)
        h = jnp.zeros((H,), jnp.float32)
        c = jnp.zeros((H,), jnp.float32)
        outs = []
        for t in range(L):
            g_ = xw[t] + jnp.dot(h, whh, precision=hp)
            i = jax.nn.sigmoid(g_[0:H])
            f = jax.nn.sigmoid(g_[H:2 * H])
            g = jnp.tanh(g_[2 * H:3 * H])
            o = jax.nn.sigmoid(g_[3 * H:4 * H])
            c_n = f * c + i * g
            h_n = o * jnp.tanh(c_n)
            m = jnp.where(t < length, 1.0, 0.0)
            h = m * h_n + (1.0 - m) * h
            c = m * c_n + (1.0 - m) * c
            outs.append(m * h)                            # padded steps -> 0
        return jnp.stack(outs)                            # (L, H)

    res = []
    for bi in range(B):
        oy = run_lstm(y[bi], raw["wih1"], raw["whh1"], raw["b1"], lengths[bi])
        oz = run_lstm(z[bi], raw["wih2"], raw["whh2"], raw["b2"], lengths[bi])
        mask = 0.5 * (jax.nn.sigmoid(oy) + jax.nn.sigmoid(oz))
        res.append(x[bi] * mask)
    return jnp.stack(res)


# ----------------------------------- main ------------------------------------
if __name__ == "__main__":
    B, L = 2, 8
    D = 32          # hidden_dim (feature dim of y and z)
    M = 32          # mod1_sz   (feature dim of x == LSTM hidden size)
    H = M

    key = jax.random.PRNGKey(0)
    ks = jax.random.split(key, 9)
    x = jax.random.normal(ks[0], (B, L, M), jnp.float32)
    y = jax.random.normal(ks[1], (B, L, D), jnp.float32)
    z = jax.random.normal(ks[2], (B, L, D), jnp.float32)
    lengths = jnp.array([8, 5], jnp.int32)

    raw = {
        "wih1": 0.1 * jax.random.normal(ks[3], (D, 4 * H), jnp.float32),
        "whh1": 0.1 * jax.random.normal(ks[4], (H, 4 * H), jnp.float32),
        "b1":   0.1 * jax.random.normal(ks[5], (4 * H,), jnp.float32),
        "wih2": 0.1 * jax.random.normal(ks[6], (D, 4 * H), jnp.float32),
        "whh2": 0.1 * jax.random.normal(ks[7], (H, 4 * H), jnp.float32),
        "b2":   0.1 * jax.random.normal(ks[8], (4 * H,), jnp.float32),
    }
    packed = pack_lstm_pair(raw["wih1"], raw["whh1"], raw["b1"],
                            raw["wih2"], raw["whh2"], raw["b2"])

    out = feedback_unit(x, y, z, lengths, packed)
    out = jax.block_until_ready(out)
    assert out.shape == (B, L, M)

    ref = reference_forward(x, y, z, lengths, raw)
    err = float(jnp.max(jnp.abs(out - ref)))
    assert jnp.allclose(out, ref, atol=2e-2, rtol=2e-2), err
    print("KERNEL_OK")
</pallas_src>

<mosaic_0001>
module attributes {stable_mosaic.version = 11 : i64} {
  func.func @feedback_kernel(%arg0: i32, %arg1: memref<2x256xf32, #tpu.memory_space<vmem>>, %arg2: memref<16x64xf32, #tpu.memory_space<vmem>>, %arg3: memref<2x1xi32, #tpu.memory_space<vmem>>, %arg4: memref<64x256xbf16, #tpu.memory_space<vmem>>, %arg5: memref<64x256xbf16, #tpu.memory_space<vmem>>, %arg6: memref<1x256xf32, #tpu.memory_space<vmem>>, %arg7: memref<2x256xf32, #tpu.memory_space<vmem>>) attributes {dimension_semantics = [#tpu.dimension_semantics<arbitrary>], iteration_bounds = array<i64: 1>, scalar_prefetch = 0 : i64, scratch_operands = 0 : i64, tpu.core_type = #tpu.core_type<tc>, window_params = [{pipeline_mode = #tpu.pipeline_mode<synchronous>, transform_indices = @transform_0, window_bounds = array<i64: 2, 256>}, {pipeline_mode = #tpu.pipeline_mode<synchronous>, transform_indices = @transform_1, window_bounds = array<i64: 16, 64>}, {pipeline_mode = #tpu.pipeline_mode<synchronous>, transform_indices = @transform_2, window_bounds = array<i64: 2, 1>}, {pipeline_mode = #tpu.pipeline_mode<synchronous>, transform_indices = @transform_3, window_bounds = array<i64: 64, 256>}, {pipeline_mode = #tpu.pipeline_mode<synchronous>, transform_indices = @transform_4, window_bounds = array<i64: 64, 256>}, {pipeline_mode = #tpu.pipeline_mode<synchronous>, transform_indices = @transform_5, window_bounds = array<i64: 1, 256>}, {pipeline_mode = #tpu.pipeline_mode<synchronous>, transform_indices = @transform_6, window_bounds = array<i64: 2, 256>}]} {
    %c0 = arith.constant 0 : index
    %c0_0 = arith.constant 0 : index
    %0 = vector.load %arg3[%c0, %c0_0] : memref<2x1xi32, #tpu.memory_space<vmem>>, vector<2x1xi32>
    %c0_1 = arith.constant 0 : index
    %c0_2 = arith.constant 0 : index
    %1 = vector.load %arg2[%c0_1, %c0_2] : memref<16x64xf32, #tpu.memory_space<vmem>>, vector<16x64xf32>
    %2 = arith.truncf %1 : vector<16x64xf32> to vector<16x64xbf16>
    %c0_3 = arith.constant 0 : index
    %c0_4 = arith.constant 0 : index
    %3 = vector.load %arg4[%c0_3, %c0_4] : memref<64x256xbf16, #tpu.memory_space<vmem>>, vector<64x256xbf16>
    %cst = arith.constant dense<0.000000e+00> : vector<16x256xf32>
    %4 = tpu.matmul %2, %3, %cst {dimension_numbers = #tpu.dot_dimension_numbers<[1], [0], [0], [1], [0, 0, 1, 1], [], []>} : vector<16x64xbf16>, vector<64x256xbf16>, vector<16x256xf32> -> vector<16x256xf32>
    %c0_5 = arith.constant 0 : index
    %c0_6 = arith.constant 0 : index
    %5 = vector.load %arg6[%c0_5, %c0_6] : memref<1x256xf32, #tpu.memory_space<vmem>>, vector<1x256xf32>
    %6 = vector.broadcast %5 : vector<1x256xf32> to vector<16x256xf32>
    %7 = arith.addf %4, %6 : vector<16x256xf32>
    %c0_7 = arith.constant 0 : index
    %c0_8 = arith.constant 0 : index
    %8 = vector.load %arg5[%c0_7, %c0_8] : memref<64x256xbf16, #tpu.memory_space<vmem>>, vector<64x256xbf16>
    %cst_9 = arith.constant 0.000000e+00 : f32
    %9 = vector.broadcast %cst_9 : f32 to vector<2x64xf32>
    %cst_10 = arith.constant 0.000000e+00 : f32
    %10 = vector.broadcast %cst_10 : f32 to vector<2x64xf32>
    %11 = vector.extract_strided_slice %7 {offsets = [0, 0], sizes = [2, 256], strides = [1, 1]} : vector<16x256xf32> to vector<2x256xf32>
    %12 = arith.truncf %9 : vector<2x64xf32> to vector<2x64xbf16>
    %cst_11 = arith.constant dense<0.000000e+00> : vector<2x256xf32>
    %13 = tpu.matmul %12, %8, %cst_11 {dimension_numbers = #tpu.dot_dimension_numbers<[1], [0], [0], [1], [0, 0, 1, 1], [], []>} : vector<2x64xbf16>, vector<64x256xbf16>, vector<2x256xf32> -> vector<2x256xf32>
    %14 = arith.addf %11, %13 : vector<2x256xf32>
    %15 = vector.extract_strided_slice %14 {offsets = [0, 0], sizes = [2, 64], strides = [1, 1]} : vector<2x256xf32> to vector<2x64xf32>
    %16 = arith.negf %15 : vector<2x64xf32>
    %17 = math.exp %16 : vector<2x64xf32>
    %cst_12 = arith.constant 1.000000e+00 : f32
    %18 = vector.broadcast %cst_12 : f32 to vector<2x64xf32>
    %19 = arith.addf %18, %17 : vector<2x64xf32>
    %20 = arith.divf %18, %19 : vector<2x64xf32>
    %21 = vector.extract_strided_slice %14 {offsets = [0, 64], sizes = [2, 64], strides = [1, 1]} : vector<2x256xf32> to vector<2x64xf32>
    %22 = arith.negf %21 : vector<2x64xf32>
    %23 = math.exp %22 : vector<2x64xf32>
    %cst_13 = arith.constant 1.000000e+00 : f32
    %24 = vector.broadcast %cst_13 : f32 to vector<2x64xf32>
    %25 = arith.addf %24, %23 : vector<2x64xf32>
    %26 = arith.divf %24, %25 : vector<2x64xf32>
    %27 = vector.extract_strided_slice %14 {offsets = [0, 128], sizes = [2, 64], strides = [1, 1]} : vector<2x256xf32> to vector<2x64xf32>
    %28 = math.tanh %27 : vector<2x64xf32>
    %29 = vector.extract_strided_slice %14 {offsets = [0, 192], sizes = [2, 64], strides = [1, 1]} : vector<2x256xf32> to vector<2x64xf32>
    %30 = arith.negf %29 : vector<2x64xf32>
    %31 = math.exp %30 : vector<2x64xf32>
    %cst_14 = arith.constant 1.000000e+00 : f32
    %32 = vector.broadcast %cst_14 : f32 to vector<2x64xf32>
    %33 = arith.addf %32, %31 : vector<2x64xf32>
    %34 = arith.divf %32, %33 : vector<2x64xf32>
    %35 = arith.mulf %26, %10 : vector<2x64xf32>
    %36 = arith.mulf %20, %28 : vector<2x64xf32>
    %37 = arith.addf %35, %36 : vector<2x64xf32>
    %38 = math.tanh %37 : vector<2x64xf32>
    %39 = arith.mulf %34, %38 : vector<2x64xf32>
    %c0_i32 = arith.constant 0 : i32
    %40 = vector.broadcast %c0_i32 : i32 to vector<2x1xi32>
    %41 = arith.cmpi sgt, %0, %40 : vector<2x1xi32>
    %42 = arith.extui %41 : vector<2x1xi1> to vector<2x1xi32>
    %43 = arith.sitofp %42 : vector<2x1xi32> to vector<2x1xf32>
    %44 = vector.broadcast %43 : vector<2x1xf32> to vector<2x64xf32>
    %45 = arith.mulf %44, %39 : vector<2x64xf32>
    %cst_15 = arith.constant 1.000000e+00 : f32
    %46 = vector.broadcast %cst_15 : f32 to vector<2x1xf32>
    %47 = arith.subf %46, %43 : vector<2x1xf32>
    %48 = vector.broadcast %47 : vector<2x1xf32> to vector<2x64xf32>
    %49 = arith.mulf %48, %9 : vector<2x64xf32>
    %50 = arith.addf %45, %49 : vector<2x64xf32>
    %51 = vector.broadcast %43 : vector<2x1xf32> to vector<2x64xf32>
    %52 = arith.mulf %51, %37 : vector<2x64xf32>
    %cst_16 = arith.constant 1.000000e+00 : f32
    %53 = vector.broadcast %cst_16 : f32 to vector<2x1xf32>
    %54 = arith.subf %53, %43 : vector<2x1xf32>
    %55 = vector.broadcast %54 : vector<2x1xf32> to vector<2x64xf32>
    %56 = arith.mulf %55, %10 : vector<2x64xf32>
    %57 = arith.addf %52, %56 : vector<2x64xf32>
    %58 = vector.broadcast %43 : vector<2x1xf32> to vector<2x64xf32>
    %59 = arith.mulf %58, %50 : vector<2x64xf32>
    %60 = vector.extract_strided_slice %59 {offsets = [0, 0], sizes = [2, 32], strides = [1, 1]} : vector<2x64xf32> to vector<2x32xf32>
    %61 = arith.negf %60 : vector<2x32xf32>
    %62 = math.exp %61 : vector<2x32xf32>
    %cst_17 = arith.constant 1.000000e+00 : f32
    %63 = vector.broadcast %cst_17 : f32 to vector<2x32xf32>
    %64 = arith.addf %63, %62 : vector<2x32xf32>
    %65 = arith.divf %63, %64 : vector<2x32xf32>
    %66 = vector.extract_strided_slice %59 {offsets = [0, 32], sizes = [2, 32], strides = [1, 1]} : vector<2x64xf32> to vector<2x32xf32>
    %67 = arith.negf %66 : vector<2x32xf32>
    %68 = math.exp %67 : vector<2x32xf32>
    %cst_18 = arith.constant 1.000000e+00 : f32
    %69 = vector.broadcast %cst_18 : f32 to vector<2x32xf32>
    %70 = arith.addf %69, %68 : vector<2x32xf32>
    %71 = arith.divf %69, %70 : vector<2x32xf32>
    %72 = arith.addf %65, %71 : vector<2x32xf32>
    %cst_19 = arith.constant 5.000000e-01 : f32
    %73 = vector.broadcast %cst_19 : f32 to vector<2x32xf32>
    %74 = arith.mulf %73, %72 : vector<2x32xf32>
    %75 = vector.extract_strided_slice %7 {offsets = [2, 0], sizes = [2, 256], strides = [1, 1]} : vector<16x256xf32> to vector<2x256xf32>
    %76 = arith.truncf %50 : vector<2x64xf32> to vector<2x64xbf16>
    %cst_20 = arith.constant dense<0.000000e+00> : vector<2x256xf32>
    %77 = tpu.matmul %76, %8, %cst_20 {dimension_numbers = #tpu.dot_dimension_numbers<[1], [0], [0], [1], [0, 0, 1, 1], [], []>} : vector<2x64xbf16>, vector<64x256xbf16>, vector<2x256xf32> -> vector<2x256xf32>
    %78 = arith.addf %75, %77 : vector<2x256xf32>
    %79 = vector.extract_strided_slice %78 {offsets = [0, 0], sizes = [2, 64], strides = [1, 1]} : vector<2x256xf32> to vector<2x64xf32>
    %80 = arith.negf %79 : vector<2x64xf32>
    %81 = math.exp %80 : vector<2x64xf32>
    %cst_21 = arith.constant 1.000000e+00 : f32
    %82 = vector.broadcast %cst_21 : f32 to vector<2x64xf32>
    %83 = arith.addf %82, %81 : vector<2x64xf32>
    %84 = arith.divf %82, %83 : vector<2x64xf32>
    %85 = vector.extract_strided_slice %78 {offsets = [0, 64], sizes = [2, 64], strides = [1, 1]} : vector<2x256xf32> to vector<2x64xf32>
    %86 = arith.negf %85 : vector<2x64xf32>
    %87 = math.exp %86 : vector<2x64xf32>
    %cst_22 = arith.constant 1.000000e+00 : f32
    %88 = vector.broadcast %cst_22 : f32 to vector<2x64xf32>
    %89 = arith.addf %88, %87 : vector<2x64xf32>
    %90 = arith.divf %88, %89 : vector<2x64xf32>
    %91 = vector.extract_strided_slice %78 {offsets = [0, 128], sizes = [2, 64], strides = [1, 1]} : vector<2x256xf32> to vector<2x64xf32>
    %92 = math.tanh %91 : vector<2x64xf32>
    %93 = vector.extract_strided_slice %78 {offsets = [0, 192], sizes = [2, 64], strides = [1, 1]} : vector<2x256xf32> to vector<2x64xf32>
    %94 = arith.negf %93 : vector<2x64xf32>
    %95 = math.exp %94 : vector<2x64xf32>
    %cst_23 = arith.constant 1.000000e+00 : f32
    %96 = vector.broadcast %cst_23 : f32 to vector<2x64xf32>
    %97 = arith.addf %96, %95 : vector<2x64xf32>
    %98 = arith.divf %96, %97 : vector<2x64xf32>
    %99 = arith.mulf %90, %57 : vector<2x64xf32>
    %100 = arith.mulf %84, %92 : vector<2x64xf32>
    %101 = arith.addf %99, %100 : vector<2x64xf32>
    %102 = math.tanh %101 : vector<2x64xf32>
    %103 = arith.mulf %98, %102 : vector<2x64xf32>
    %c1_i32 = arith.constant 1 : i32
    %104 = vector.broadcast %c1_i32 : i32 to vector<2x1xi32>
    %105 = arith.cmpi sgt, %0, %104 : vector<2x1xi32>
    %106 = arith.extui %105 : vector<2x1xi1> to vector<2x1xi32>
    %107 = arith.sitofp %106 : vector<2x1xi32> to vector<2x1xf32>
    %108 = vector.broadcast %107 : vector<2x1xf32> to vector<2x64xf32>
    %109 = arith.mulf %108, %103 : vector<2x64xf32>
    %cst_24 = arith.constant 1.000000e+00 : f32
    %110 = vector.broadcast %cst_24 : f32 to vector<2x1xf32>
    %111 = arith.subf %110, %107 : vector<2x1xf32>
    %112 = vector.broadcast %111 : vector<2x1xf32> to vector<2x64xf32>
    %113 = arith.mulf %112, %50 : vector<2x64xf32>
    %114 = arith.addf %109, %113 : vector<2x64xf32>
    %115 = vector.broadcast %107 : vector<2x1xf32> to vector<2x64xf32>
    %116 = arith.mulf %115, %101 : vector<2x64xf32>
    %cst_25 = arith.constant 1.000000e+00 : f32
    %117 = vector.broadcast %cst_25 : f32 to vector<2x1xf32>
    %118 = arith.subf %117, %107 : vector<2x1xf32>
    %119 = vector.broadcast %118 : vector<2x1xf32> to vector<2x64xf32>
    %120 = arith.mulf %119, %57 : vector<2x64xf32>
    %121 = arith.addf %116, %120 : vector<2x64xf32>
    %122 = vector.broadcast %107 : vector<2x1xf32> to vector<2x64xf32>
    %123 = arith.mulf %122, %114 : vector<2x64xf32>
    %124 = vector.extract_strided_slice %123 {offsets = [0, 0], sizes = [2, 32], strides = [1, 1]} : vector<2x64xf32> to vector<2x32xf32>
    %125 = arith.negf %124 : vector<2x32xf32>
    %126 = math.exp %125 : vector<2x32xf32>
    %cst_26 = arith.constant 1.000000e+00 : f32
    %127 = vector.broadcast %cst_26 : f32 to vector<2x32xf32>
    %128 = arith.addf %127, %126 : vector<2x32xf32>
    %129 = arith.divf %127, %128 : vector<2x32xf32>
    %130 = vector.extract_strided_slice %123 {offsets = [0, 32], sizes = [2, 32], strides = [1, 1]} : vector<2x64xf32> to vector<2x32xf32>
    %131 = arith.negf %130 : vector<2x32xf32>
    %132 = math.exp %131 : vector<2x32xf32>
    %cst_27 = arith.constant 1.000000e+00 : f32
    %133 = vector.broadcast %cst_27 : f32 to vector<2x32xf32>
    %134 = arith.addf %133, %132 : vector<2x32xf32>
    %135 = arith.divf %133, %134 : vector<2x32xf32>
    %136 = arith.addf %129, %135 : vector<2x32xf32>
    %cst_28 = arith.constant 5.000000e-01 : f32
    %137 = vector.broadcast %cst_28 : f32 to vector<2x32xf32>
    %138 = arith.mulf %137, %136 : vector<2x32xf32>
    %139 = vector.extract_strided_slice %7 {offsets = [4, 0], sizes = [2, 256], strides = [1, 1]} : vector<16x256xf32> to vector<2x256xf32>
    %140 = arith.truncf %114 : vector<2x64xf32> to vector<2x64xbf16>
    %cst_29 = arith.constant dense<0.000000e+00> : vector<2x256xf32>
    %141 = tpu.matmul %140, %8, %cst_29 {dimension_numbers = #tpu.dot_dimension_numbers<[1], [0], [0], [1], [0, 0, 1, 1], [], []>} : vector<2x64xbf16>, vector<64x256xbf16>, vector<2x256xf32> -> vector<2x256xf32>
    %142 = arith.addf %139, %141 : vector<2x256xf32>
    %143 = vector.extract_strided_slice %142 {offsets = [0, 0], sizes = [2, 64], strides = [1, 1]} : vector<2x256xf32> to vector<2x64xf32>
    %144 = arith.negf %143 : vector<2x64xf32>
    %145 = math.exp %144 : vector<2x64xf32>
    %cst_30 = arith.constant 1.000000e+00 : f32
    %146 = vector.broadcast %cst_30 : f32 to vector<2x64xf32>
    %147 = arith.addf %146, %145 : vector<2x64xf32>
    %148 = arith.divf %146, %147 : vector<2x64xf32>
    %149 = vector.extract_strided_slice %142 {offsets = [0, 64], sizes = [2, 64], strides = [1, 1]} : vector<2x256xf32> to vector<2x64xf32>
    %150 = arith.negf %149 : vector<2x64xf32>
    %151 = math.exp %150 : vector<2x64xf32>
    %cst_31 = arith.constant 1.000000e+00 : f32
    %152 = vector.broadcast %cst_31 : f32 to vector<2x64xf32>
    %153 = arith.addf %152, %151 : vector<2x64xf32>
    %154 = arith.divf %152, %153 : vector<2x64xf32>
    %155 = vector.extract_strided_slice %142 {offsets = [0, 128], sizes = [2, 64], strides = [1, 1]} : vector<2x256xf32> to vector<2x64xf32>
    %156 = math.tanh %155 : vector<2x64xf32>
    %157 = vector.extract_strided_slice %142 {offsets = [0, 192], sizes = [2, 64], strides = [1, 1]} : vector<2x256xf32> to vector<2x64xf32>
    %158 = arith.negf %157 : vector<2x64xf32>
    %159 = math.exp %158 : vector<2x64xf32>
    %cst_32 = arith.constant 1.000000e+00 : f32
    %160 = vector.broadcast %cst_32 : f32 to vector<2x64xf32>
    %161 = arith.addf %160, %159 : vector<2x64xf32>
    %162 = arith.divf %160, %161 : vector<2x64xf32>
    %163 = arith.mulf %154, %121 : vector<2x64xf32>
    %164 = arith.mulf %148, %156 : vector<2x64xf32>
    %165 = arith.addf %163, %164 : vector<2x64xf32>
    %166 = math.tanh %165 : vector<2x64xf32>
    %167 = arith.mulf %162, %166 : vector<2x64xf32>
    %c2_i32 = arith.constant 2 : i32
    %168 = vector.broadcast %c2_i32 : i32 to vector<2x1xi32>
    %169 = arith.cmpi sgt, %0, %168 : vector<2x1xi32>
    %170 = arith.extui %169 : vector<2x1xi1> to vector<2x1xi32>
    %171 = arith.sitofp %170 : vector<2x1xi32> to vector<2x1xf32>
    %172 = vector.broadcast %171 : vector<2x1xf32> to vector<2x64xf32>
    %173 = arith.mulf %172, %167 : vector<2x64xf32>
    %cst_33 = arith.constant 1.000000e+00 : f32
    %174 = vector.broadcast %cst_33 : f32 to vector<2x1xf32>
    %175 = arith.subf %174, %171 : vector<2x1xf32>
    %176 = vector.broadcast %175 : vector<2x1xf32> to vector<2x64xf32>
    %177 = arith.mulf %176, %114 : vector<2x64xf32>
    %178 = arith.addf %173, %177 : vector<2x64xf32>
    %179 = vector.broadcast %171 : vector<2x1xf32> to vector<2x64xf32>
    %180 = arith.mulf %179, %165 : vector<2x64xf32>
    %cst_34 = arith.constant 1.000000e+00 : f32
    %181 = vector.broadcast %cst_34 : f32 to vector<2x1xf32>
    %182 = arith.subf %181, %171 : vector<2x1xf32>
    %183 = vector.broadcast %182 : vector<2x1xf32> to vector<2x64xf32>
    %184 = arith.mulf %183, %121 : vector<2x64xf32>
    %185 = arith.addf %180, %184 : vector<2x64xf32>
    %186 = vector.broadcast %171 : vector<2x1xf32> to vector<2x64xf32>
    %187 = arith.mulf %186, %178 : vector<2x64xf32>
    %188 = vector.extract_strided_slice %187 {offsets = [0, 0], sizes = [2, 32], strides = [1, 1]} : vector<2x64xf32> to vector<2x32xf32>
    %189 = arith.negf %188 : vector<2x32xf32>
    %190 = math.exp %189 : vector<2x32xf32>
    %cst_35 = arith.constant 1.000000e+00 : f32
    %191 = vector.broadcast %cst_35 : f32 to vector<2x32xf32>
    %192 = arith.addf %191, %190 : vector<2x32xf32>
    %193 = arith.divf %191, %192 : vector<2x32xf32>
    %194 = vector.extract_strided_slice %187 {offsets = [0, 32], sizes = [2, 32], strides = [1, 1]} : vector<2x64xf32> to vector<2x32xf32>
    %195 = arith.negf %194 : vector<2x32xf32>
    %196 = math.exp %195 : vector<2x32xf32>
    %cst_36 = arith.constant 1.000000e+00 : f32
    %197 = vector.broadcast %cst_36 : f32 to vector<2x32xf32>
    %198 = arith.addf %197, %196 : vector<2x32xf32>
    %199 = arith.divf %197, %198 : vector<2x32xf32>
    %200 = arith.addf %193, %199 : vector<2x32xf32>
    %cst_37 = arith.constant 5.000000e-01 : f32
    %201 = vector.broadcast %cst_37 : f32 to vector<2x32xf32>
    %202 = arith.mulf %201, %200 : vector<2x32xf32>
    %203 = vector.extract_strided_slice %7 {offsets = [6, 0], sizes = [2, 256], strides = [1, 1]} : vector<16x256xf32> to vector<2x256xf32>
    %204 = arith.truncf %178 : vector<2x64xf32> to vector<2x64xbf16>
    %cst_38 = arith.constant dense<0.000000e+00> : vector<2x256xf32>
    %205 = tpu.matmul %204, %8, %cst_38 {dimension_numbers = #tpu.dot_dimension_numbers<[1], [0], [0], [1], [0, 0, 1, 1], [], []>} : vector<2x64xbf16>, vector<64x256xbf16>, vector<2x256xf32> -> vector<2x256xf32>
    %206 = arith.addf %203, %205 : vector<2x256xf32>
    %207 = vector.extract_strided_slice %206 {offsets = [0, 0], sizes = [2, 64], strides = [1, 1]} : vector<2x256xf32> to vector<2x64xf32>
    %208 = arith.negf %207 : vector<2x64xf32>
    %209 = math.exp %208 : vector<2x64xf32>
    %cst_39 = arith.constant 1.000000e+00 : f32
    %210 = vector.broadcast %cst_39 : f32 to vector<2x64xf32>
    %211 = arith.addf %210, %209 : vector<2x64xf32>
    %212 = arith.divf %210, %211 : vector<2x64xf32>
    %213 = vector.extract_strided_slice %206 {offsets = [0, 64], sizes = [2, 64], strides = [1, 1]} : vector<2x256xf32> to vector<2x64xf32>
    %214 = arith.negf %213 : vector<2x64xf32>
    %215 = math.exp %214 : vector<2x64xf32>
    %cst_40 = arith.constant 1.000000e+00 : f32
    %216 = vector.broadcast %cst_40 : f32 to vector<2x64xf32>
    %217 = arith.addf %216, %215 : vector<2x64xf32>
    %218 = arith.divf %216, %217 : vector<2x64xf32>
    %219 = vector.extract_strided_slice %206 {offsets = [0, 128], sizes = [2, 64], strides = [1, 1]} : vector<2x256xf32> to vector<2x64xf32>
    %220 = math.tanh %219 : vector<2x64xf32>
    %221 = vector.extract_strided_slice %206 {offsets = [0, 192], sizes = [2, 64], strides = [1, 1]} : vector<2x256xf32> to vector<2x64xf32>
    %222 = arith.negf %221 : vector<2x64xf32>
    %223 = math.exp %222 : vector<2x64xf32>
    %cst_41 = arith.constant 1.000000e+00 : f32
    %224 = vector.broadcast %cst_41 : f32 to vector<2x64xf32>
    %225 = arith.addf %224, %223 : vector<2x64xf32>
    %226 = arith.divf %224, %225 : vector<2x64xf32>
    %227 = arith.mulf %218, %185 : vector<2x64xf32>
    %228 = arith.mulf %212, %220 : vector<2x64xf32>
    %229 = arith.addf %227, %228 : vector<2x64xf32>
    %230 = math.tanh %229 : vector<2x64xf32>
    %231 = arith.mulf %226, %230 : vector<2x64xf32>
    %c3_i32 = arith.constant 3 : i32
    %232 = vector.broadcast %c3_i32 : i32 to vector<2x1xi32>
    %233 = arith.cmpi sgt, %0, %232 : vector<2x1xi32>
    %234 = arith.extui %233 : vector<2x1xi1> to vector<2x1xi32>
    %235 = arith.sitofp %234 : vector<2x1xi32> to vector<2x1xf32>
    %236 = vector.broadcast %235 : vector<2x1xf32> to vector<2x64xf32>
    %237 = arith.mulf %236, %231 : vector<2x64xf32>
    %cst_42 = arith.constant 1.000000e+00 : f32
    %238 = vector.broadcast %cst_42 : f32 to vector<2x1xf32>
    %239 = arith.subf %238, %235 : vector<2x1xf32>
    %240 = vector.broadcast %239 : vector<2x1xf32> to vector<2x64xf32>
    %241 = arith.mulf %240, %178 : vector<2x64xf32>
    %242 = arith.addf %237, %241 : vector<2x64xf32>
    %243 = vector.broadcast %235 : vector<2x1xf32> to vector<2x64xf32>
    %244 = arith.mulf %243, %229 : vector<2x64xf32>
    %cst_43 = arith.constant 1.000000e+00 : f32
    %245 = vector.broadcast %cst_43 : f32 to vector<2x1xf32>
    %246 = arith.subf %245, %235 : vector<2x1xf32>
    %247 = vector.broadcast %246 : vector<2x1xf32> to vector<2x64xf32>
    %248 = arith.mulf %247, %185 : vector<2x64xf32>
    %249 = arith.addf %244, %248 : vector<2x64xf32>
    %250 = vector.broadcast %235 : vector<2x1xf32> to vector<2x64xf32>
    %251 = arith.mulf %250, %242 : vector<2x64xf32>
    %252 = vector.extract_strided_slice %251 {offsets = [0, 0], sizes = [2, 32], strides = [1, 1]} : vector<2x64xf32> to vector<2x32xf32>
    %253 = arith.negf %252 : vector<2x32xf32>
    %254 = math.exp %253 : vector<2x32xf32>
    %cst_44 = arith.constant 1.000000e+00 : f32
    %255 = vector.broadcast %cst_44 : f32 to vector<2x32xf32>
    %256 = arith.addf %255, %254 : vector<2x32xf32>
    %257 = arith.divf %255, %256 : vector<2x32xf32>
    %258 = vector.extract_strided_slice %251 {offsets = [0, 32], sizes = [2, 32], strides = [1, 1]} : vector<2x64xf32> to vector<2x32xf32>
    %259 = arith.negf %258 : vector<2x32xf32>
    %260 = math.exp %259 : vector<2x32xf32>
    %cst_45 = arith.constant 1.000000e+00 : f32
    %261 = vector.broadcast %cst_45 : f32 to vector<2x32xf32>
    %262 = arith.addf %261, %260 : vector<2x32xf32>
    %263 = arith.divf %261, %262 : vector<2x32xf32>
    %264 = arith.addf %257, %263 : vector<2x32xf32>
    %cst_46 = arith.constant 5.000000e-01 : f32
    %265 = vector.broadcast %cst_46 : f32 to vector<2x32xf32>
    %266 = arith.mulf %265, %264 : vector<2x32xf32>
    %267 = vector.extract_strided_slice %7 {offsets = [8, 0], sizes = [2, 256], strides = [1, 1]} : vector<16x256xf32> to vector<2x256xf32>
    %268 = arith.truncf %242 : vector<2x64xf32> to vector<2x64xbf16>
    %cst_47 = arith.constant dense<0.000000e+00> : vector<2x256xf32>
    %269 = tpu.matmul %268, %8, %cst_47 {dimension_numbers = #tpu.dot_dimension_numbers<[1], [0], [0], [1], [0, 0, 1, 1], [], []>} : vector<2x64xbf16>, vector<64x256xbf16>, vector<2x256xf32> -> vector<2x256xf32>
    %270 = arith.addf %267, %269 : vector<2x256xf32>
    %271 = vector.extract_strided_slice %270 {offsets = [0, 0], sizes = [2, 64], strides = [1, 1]} : vector<2x256xf32> to vector<2x64xf32>
    %272 = arith.negf %271 : vector<2x64xf32>
    %273 = math.exp %272 : vector<2x64xf32>
    %cst_48 = arith.constant 1.000000e+00 : f32
    %274 = vector.broadcast %cst_48 : f32 to vector<2x64xf32>
    %275 = arith.addf %274, %273 : vector<2x64xf32>
    %276 = arith.divf %274, %275 : vector<2x64xf32>
    %277 = vector.extract_strided_slice %270 {offsets = [0, 64], sizes = [2, 64], strides = [1, 1]} : vector<2x256xf32> to vector<2x64xf32>
    %278 = arith.negf %277 : vector<2x64xf32>
    %279 = math.exp %278 : vector<2x64xf32>
    %cst_49 = arith.constant 1.000000e+00 : f32
    %280 = vector.broadcast %cst_49 : f32 to vector<2x64xf32>
    %281 = arith.addf %280, %279 : vector<2x64xf32>
    %282 = arith.divf %280, %281 : vector<2x64xf32>
    %283 = vector.extract_strided_slice %270 {offsets = [0, 128], sizes = [2, 64], strides = [1, 1]} : vector<2x256xf32> to vector<2x64xf32>
    %284 = math.tanh %283 : vector<2x64xf32>
    %285 = vector.extract_strided_slice %270 {offsets = [0, 192], sizes = [2, 64], strides = [1, 1]} : vector<2x256xf32> to vector<2x64xf32>
    %286 = arith.negf %285 : vector<2x64xf32>
    %287 = math.exp %286 : vector<2x64xf32>
    %cst_50 = arith.constant 1.000000e+00 : f32
    %288 = vector.broadcast %cst_50 : f32 to vector<2x64xf32>
    %289 = arith.addf %288, %287 : vector<2x64xf32>
    %290 = arith.divf %288, %289 : vector<2x64xf32>
    %291 = arith.mulf %282, %249 : vector<2x64xf32>
    %292 = arith.mulf %276, %284 : vector<2x64xf32>
    %293 = arith.addf %291, %292 : vector<2x64xf32>
    %294 = math.tanh %293 : vector<2x64xf32>
    %295 = arith.mulf %290, %294 : vector<2x64xf32>
    %c4_i32 = arith.constant 4 : i32
    %296 = vector.broadcast %c4_i32 : i32 to vector<2x1xi32>
    %297 = arith.cmpi sgt, %0, %296 : vector<2x1xi32>
    %298 = arith.extui %297 : vector<2x1xi1> to vector<2x1xi32>
    %299 = arith.sitofp %298 : vector<2x1xi32> to vector<2x1xf32>
    %300 = vector.broadcast %299 : vector<2x1xf32> to vector<2x64xf32>
    %301 = arith.mulf %300, %295 : vector<2x64xf32>
    %cst_51 = arith.constant 1.000000e+00 : f32
    %302 = vector.broadcast %cst_51 : f32 to vector<2x1xf32>
    %303 = arith.subf %302, %299 : vector<2x1xf32>
    %304 = vector.broadcast %303 : vector<2x1xf32> to vector<2x64xf32>
    %305 = arith.mulf %304, %242 : vector<2x64xf32>
    %306 = arith.addf %301, %305 : vector<2x64xf32>
    %307 = vector.broadcast %299 : vector<2x1xf32> to vector<2x64xf32>
    %308 = arith.mulf %307, %293 : vector<2x64xf32>
    %cst_52 = arith.constant 1.000000e+00 : f32
    %309 = vector.broadcast %cst_52 : f32 to vector<2x1xf32>
    %310 = arith.subf %309, %299 : vector<2x1xf32>
    %311 = vector.broadcast %310 : vector<2x1xf32> to vector<2x64xf32>
    %312 = arith.mulf %311, %249 : vector<2x64xf32>
    %313 = arith.addf %308, %312 : vector<2x64xf32>
    %314 = vector.broadcast %299 : vector<2x1xf32> to vector<2x64xf32>
    %315 = arith.mulf %314, %306 : vector<2x64xf32>
    %316 = vector.extract_strided_slice %315 {offsets = [0, 0], sizes = [2, 32], strides = [1, 1]} : vector<2x64xf32> to vector<2x32xf32>
    %317 = arith.negf %316 : vector<2x32xf32>
    %318 = math.exp %317 : vector<2x32xf32>
    %cst_53 = arith.constant 1.000000e+00 : f32
    %319 = vector.broadcast %cst_53 : f32 to vector<2x32xf32>
    %320 = arith.addf %319, %318 : vector<2x32xf32>
    %321 = arith.divf %319, %320 : vector<2x32xf32>
    %322 = vector.extract_strided_slice %315 {offsets = [0, 32], sizes = [2, 32], strides = [1, 1]} : vector<2x64xf32> to vector<2x32xf32>
    %323 = arith.negf %322 : vector<2x32xf32>
    %324 = math.exp %323 : vector<2x32xf32>
    %cst_54 = arith.constant 1.000000e+00 : f32
    %325 = vector.broadcast %cst_54 : f32 to vector<2x32xf32>
    %326 = arith.addf %325, %324 : vector<2x32xf32>
    %327 = arith.divf %325, %326 : vector<2x32xf32>
    %328 = arith.addf %321, %327 : vector<2x32xf32>
    %cst_55 = arith.constant 5.000000e-01 : f32
    %329 = vector.broadcast %cst_55 : f32 to vector<2x32xf32>
    %330 = arith.mulf %329, %328 : vector<2x32xf32>
    %331 = vector.extract_strided_slice %7 {offsets = [10, 0], sizes = [2, 256], strides = [1, 1]} : vector<16x256xf32> to vector<2x256xf32>
    %332 = arith.truncf %306 : vector<2x64xf32> to vector<2x64xbf16>
    %cst_56 = arith.constant dense<0.000000e+00> : vector<2x256xf32>
    %333 = tpu.matmul %332, %8, %cst_56 {dimension_numbers = #tpu.dot_dimension_numbers<[1], [0], [0], [1], [0, 0, 1, 1], [], []>} : vector<2x64xbf16>, vector<64x256xbf16>, vector<2x256xf32> -> vector<2x256xf32>
    %334 = arith.addf %331, %333 : vector<2x256xf32>
    %335 = vector.extract_strided_slice %334 {offsets = [0, 0], sizes = [2, 64], strides = [1, 1]} : vector<2x256xf32> to vector<2x64xf32>
    %336 = arith.negf %335 : vector<2x64xf32>
    %337 = math.exp %336 : vector<2x64xf32>
    %cst_57 = arith.constant 1.000000e+00 : f32
    %338 = vector.broadcast %cst_57 : f32 to vector<2x64xf32>
    %339 = arith.addf %338, %337 : vector<2x64xf32>
    %340 = arith.divf %338, %339 : vector<2x64xf32>
    %341 = vector.extract_strided_slice %334 {offsets = [0, 64], sizes = [2, 64], strides = [1, 1]} : vector<2x256xf32> to vector<2x64xf32>
    %342 = arith.negf %341 : vector<2x64xf32>
    %343 = math.exp %342 : vector<2x64xf32>
    %cst_58 = arith.constant 1.000000e+00 : f32
    %344 = vector.broadcast %cst_58 : f32 to vector<2x64xf32>
    %345 = arith.addf %344, %343 : vector<2x64xf32>
    %346 = arith.divf %344, %345 : vector<2x64xf32>
    %347 = vector.extract_strided_slice %334 {offsets = [0, 128], sizes = [2, 64], strides = [1, 1]} : vector<2x256xf32> to vector<2x64xf32>
    %348 = math.tanh %347 : vector<2x64xf32>
    %349 = vector.extract_strided_slice %334 {offsets = [0, 192], sizes = [2, 64], strides = [1, 1]} : vector<2x256xf32> to vector<2x64xf32>
    %350 = arith.negf %349 : vector<2x64xf32>
    %351 = math.exp %350 : vector<2x64xf32>
    %cst_59 = arith.constant 1.000000e+00 : f32
    %352 = vector.broadcast %cst_59 : f32 to vector<2x64xf32>
    %353 = arith.addf %352, %351 : vector<2x64xf32>
    %354 = arith.divf %352, %353 : vector<2x64xf32>
    %355 = arith.mulf %346, %313 : vector<2x64xf32>
    %356 = arith.mulf %340, %348 : vector<2x64xf32>
    %357 = arith.addf %355, %356 : vector<2x64xf32>
    %358 = math.tanh %357 : vector<2x64xf32>
    %359 = arith.mulf %354, %358 : vector<2x64xf32>
    %c5_i32 = arith.constant 5 : i32
    %360 = vector.broadcast %c5_i32 : i32 to vector<2x1xi32>
    %361 = arith.cmpi sgt, %0, %360 : vector<2x1xi32>
    %362 = arith.extui %361 : vector<2x1xi1> to vector<2x1xi32>
    %363 = arith.sitofp %362 : vector<2x1xi32> to vector<2x1xf32>
    %364 = vector.broadcast %363 : vector<2x1xf32> to vector<2x64xf32>
    %365 = arith.mulf %364, %359 : vector<2x64xf32>
    %cst_60 = arith.constant 1.000000e+00 : f32
    %366 = vector.broadcast %cst_60 : f32 to vector<2x1xf32>
    %367 = arith.subf %366, %363 : vector<2x1xf32>
    %368 = vector.broadcast %367 : vector<2x1xf32> to vector<2x64xf32>
    %369 = arith.mulf %368, %306 : vector<2x64xf32>
    %370 = arith.addf %365, %369 : vector<2x64xf32>
    %371 = vector.broadcast %363 : vector<2x1xf32> to vector<2x64xf32>
    %372 = arith.mulf %371, %357 : vector<2x64xf32>
    %cst_61 = arith.constant 1.000000e+00 : f32
    %373 = vector.broadcast %cst_61 : f32 to vector<2x1xf32>
    %374 = arith.subf %373, %363 : vector<2x1xf32>
    %375 = vector.broadcast %374 : vector<2x1xf32> to vector<2x64xf32>
    %376 = arith.mulf %375, %313 : vector<2x64xf32>
    %377 = arith.addf %372, %376 : vector<2x64xf32>
    %378 = vector.broadcast %363 : vector<2x1xf32> to vector<2x64xf32>
    %379 = arith.mulf %378, %370 : vector<2x64xf32>
    %380 = vector.extract_strided_slice %379 {offsets = [0, 0], sizes = [2, 32], strides = [1, 1]} : vector<2x64xf32> to vector<2x32xf32>
    %381 = arith.negf %380 : vector<2x32xf32>
    %382 = math.exp %381 : vector<2x32xf32>
    %cst_62 = arith.constant 1.000000e+00 : f32
    %383 = vector.broadcast %cst_62 : f32 to vector<2x32xf32>
    %384 = arith.addf %383, %382 : vector<2x32xf32>
    %385 = arith.divf %383, %384 : vector<2x32xf32>
    %386 = vector.extract_strided_slice %379 {offsets = [0, 32], sizes = [2, 32], strides = [1, 1]} : vector<2x64xf32> to vector<2x32xf32>
    %387 = arith.negf %386 : vector<2x32xf32>
    %388 = math.exp %387 : vector<2x32xf32>
    %cst_63 = arith.constant 1.000000e+00 : f32
    %389 = vector.broadcast %cst_63 : f32 to vector<2x32xf32>
    %390 = arith.addf %389, %388 : vector<2x32xf32>
    %391 = arith.divf %389, %390 : vector<2x32xf32>
    %392 = arith.addf %385, %391 : vector<2x32xf32>
    %cst_64 = arith.constant 5.000000e-01 : f32
    %393 = vector.broadcast %cst_64 : f32 to vector<2x32xf32>
    %394 = arith.mulf %393, %392 : vector<2x32xf32>
    %395 = vector.extract_strided_slice %7 {offsets = [12, 0], sizes = [2, 256], strides = [1, 1]} : vector<16x256xf32> to vector<2x256xf32>
    %396 = arith.truncf %370 : vector<2x64xf32> to vector<2x64xbf16>
    %cst_65 = arith.constant dense<0.000000e+00> : vector<2x256xf32>
    %397 = tpu.matmul %396, %8, %cst_65 {dimension_numbers = #tpu.dot_dimension_numbers<[1], [0], [0], [1], [0, 0, 1, 1], [], []>} : vector<2x64xbf16>, vector<64x256xbf16>, vector<2x256xf32> -> vector<2x256xf32>
    %398 = arith.addf %395, %397 : vector<2x256xf32>
    %399 = vector.extract_strided_slice %398 {offsets = [0, 0], sizes = [2, 64], strides = [1, 1]} : vector<2x256xf32> to vector<2x64xf32>
    %400 = arith.negf %399 : vector<2x64xf32>
    %401 = math.exp %400 : vector<2x64xf32>
    %cst_66 = arith.constant 1.000000e+00 : f32
    %402 = vector.broadcast %cst_66 : f32 to vector<2x64xf32>
    %403 = arith.addf %402, %401 : vector<2x64xf32>
    %404 = arith.divf %402, %403 : vector<2x64xf32>
    %405 = vector.extract_strided_slice %398 {offsets = [0, 64], sizes = [2, 64], strides = [1, 1]} : vector<2x256xf32> to vector<2x64xf32>
    %406 = arith.negf %405 : vector<2x64xf32>
    %407 = math.exp %406 : vector<2x64xf32>
    %cst_67 = arith.constant 1.000000e+00 : f32
    %408 = vector.broadcast %cst_67 : f32 to vector<2x64xf32>
    %409 = arith.addf %408, %407 : vector<2x64xf32>
    %410 = arith.divf %408, %409 : vector<2x64xf32>
    %411 = vector.extract_strided_slice %398 {offsets = [0, 128], sizes = [2, 64], strides = [1, 1]} : vector<2x256xf32> to vector<2x64xf32>
    %412 = math.tanh %411 : vector<2x64xf32>
    %413 = vector.extract_strided_slice %398 {offsets = [0, 192], sizes = [2, 64], strides = [1, 1]} : vector<2x256xf32> to vector<2x64xf32>
    %414 = arith.negf %413 : vector<2x64xf32>
    %415 = math.exp %414 : vector<2x64xf32>
    %cst_68 = arith.constant 1.000000e+00 : f32
    %416 = vector.broadcast %cst_68 : f32 to vector<2x64xf32>
    %417 = arith.addf %416, %415 : vector<2x64xf32>
    %418 = arith.divf %416, %417 : vector<2x64xf32>
    %419 = arith.mulf %410, %377 : vector<2x64xf32>
    %420 = arith.mulf %404, %412 : vector<2x64xf32>
    %421 = arith.addf %419, %420 : vector<2x64xf32>
    %422 = math.tanh %421 : vector<2x64xf32>
    %423 = arith.mulf %418, %422 : vector<2x64xf32>
    %c6_i32 = arith.constant 6 : i32
    %424 = vector.broadcast %c6_i32 : i32 to vector<2x1xi32>
    %425 = arith.cmpi sgt, %0, %424 : vector<2x1xi32>
    %426 = arith.extui %425 : vector<2x1xi1> to vector<2x1xi32>
    %427 = arith.sitofp %426 : vector<2x1xi32> to vector<2x1xf32>
    %428 = vector.broadcast %427 : vector<2x1xf32> to vector<2x64xf32>
    %429 = arith.mulf %428, %423 : vector<2x64xf32>
    %cst_69 = arith.constant 1.000000e+00 : f32
    %430 = vector.broadcast %cst_69 : f32 to vector<2x1xf32>
    %431 = arith.subf %430, %427 : vector<2x1xf32>
    %432 = vector.broadcast %431 : vector<2x1xf32> to vector<2x64xf32>
    %433 = arith.mulf %432, %370 : vector<2x64xf32>
    %434 = arith.addf %429, %433 : vector<2x64xf32>
    %435 = vector.broadcast %427 : vector<2x1xf32> to vector<2x64xf32>
    %436 = arith.mulf %435, %421 : vector<2x64xf32>
    %cst_70 = arith.constant 1.000000e+00 : f32
    %437 = vector.broadcast %cst_70 : f32 to vector<2x1xf32>
    %438 = arith.subf %437, %427 : vector<2x1xf32>
    %439 = vector.broadcast %438 : vector<2x1xf32> to vector<2x64xf32>
    %440 = arith.mulf %439, %377 : vector<2x64xf32>
    %441 = arith.addf %436, %440 : vector<2x64xf32>
    %442 = vector.broadcast %427 : vector<2x1xf32> to vector<2x64xf32>
    %443 = arith.mulf %442, %434 : vector<2x64xf32>
    %444 = vector.extract_strided_slice %443 {offsets = [0, 0], sizes = [2, 32], strides = [1, 1]} : vector<2x64xf32> to vector<2x32xf32>
    %445 = arith.negf %444 : vector<2x32xf32>
    %446 = math.exp %445 : vector<2x32xf32>
    %cst_71 = arith.constant 1.000000e+00 : f32
    %447 = vector.broadcast %cst_71 : f32 to vector<2x32xf32>
    %448 = arith.addf %447, %446 : vector<2x32xf32>
    %449 = arith.divf %447, %448 : vector<2x32xf32>
    %450 = vector.extract_strided_slice %443 {offsets = [0, 32], sizes = [2, 32], strides = [1, 1]} : vector<2x64xf32> to vector<2x32xf32>
    %451 = arith.negf %450 : vector<2x32xf32>
    %452 = math.exp %451 : vector<2x32xf32>
    %cst_72 = arith.constant 1.000000e+00 : f32
    %453 = vector.broadcast %cst_72 : f32 to vector<2x32xf32>
    %454 = arith.addf %453, %452 : vector<2x32xf32>
    %455 = arith.divf %453, %454 : vector<2x32xf32>
    %456 = arith.addf %449, %455 : vector<2x32xf32>
    %cst_73 = arith.constant 5.000000e-01 : f32
    %457 = vector.broadcast %cst_73 : f32 to vector<2x32xf32>
    %458 = arith.mulf %457, %456 : vector<2x32xf32>
    %459 = vector.extract_strided_slice %7 {offsets = [14, 0], sizes = [2, 256], strides = [1, 1]} : vector<16x256xf32> to vector<2x256xf32>
    %460 = arith.truncf %434 : vector<2x64xf32> to vector<2x64xbf16>
    %cst_74 = arith.constant dense<0.000000e+00> : vector<2x256xf32>
    %461 = tpu.matmul %460, %8, %cst_74 {dimension_numbers = #tpu.dot_dimension_numbers<[1], [0], [0], [1], [0, 0, 1, 1], [], []>} : vector<2x64xbf16>, vector<64x256xbf16>, vector<2x256xf32> -> vector<2x256xf32>
    %462 = arith.addf %459, %461 : vector<2x256xf32>
    %463 = vector.extract_strided_slice %462 {offsets = [0, 0], sizes = [2, 64], strides = [1, 1]} : vector<2x256xf32> to vector<2x64xf32>
    %464 = arith.negf %463 : vector<2x64xf32>
    %465 = math.exp %464 : vector<2x64xf32>
    %cst_75 = arith.constant 1.000000e+00 : f32
    %466 = vector.broadcast %cst_75 : f32 to vector<2x64xf32>
    %467 = arith.addf %466, %465 : vector<2x64xf32>
    %468 = arith.divf %466, %467 : vector<2x64xf32>
    %469 = vector.extract_strided_slice %462 {offsets = [0, 64], sizes = [2, 64], strides = [1, 1]} : vector<2x256xf32> to vector<2x64xf32>
    %470 = arith.negf %469 : vector<2x64xf32>
    %471 = math.exp %470 : vector<2x64xf32>
    %cst_76 = arith.constant 1.000000e+00 : f32
    %472 = vector.broadcast %cst_76 : f32 to vector<2x64xf32>
    %473 = arith.addf %472, %471 : vector<2x64xf32>
    %474 = arith.divf %472, %473 : vector<2x64xf32>
    %475 = vector.extract_strided_slice %462 {offsets = [0, 128], sizes = [2, 64], strides = [1, 1]} : vector<2x256xf32> to vector<2x64xf32>
    %476 = math.tanh %475 : vector<2x64xf32>
    %477 = vector.extract_strided_slice %462 {offsets = [0, 192], sizes = [2, 64], strides = [1, 1]} : vector<2x256xf32> to vector<2x64xf32>
    %478 = arith.negf %477 : vector<2x64xf32>
    %479 = math.exp %478 : vector<2x64xf32>
    %cst_77 = arith.constant 1.000000e+00 : f32
    %480 = vector.broadcast %cst_77 : f32 to vector<2x64xf32>
    %481 = arith.addf %480, %479 : vector<2x64xf32>
    %482 = arith.divf %480, %481 : vector<2x64xf32>
    %483 = arith.mulf %474, %441 : vector<2x64xf32>
    %484 = arith.mulf %468, %476 : vector<2x64xf32>
    %485 = arith.addf %483, %484 : vector<2x64xf32>
    %486 = math.tanh %485 : vector<2x64xf32>
    %487 = arith.mulf %482, %486 : vector<2x64xf32>
    %c7_i32 = arith.constant 7 : i32
    %488 = vector.broadcast %c7_i32 : i32 to vector<2x1xi32>
    %489 = arith.cmpi sgt, %0, %488 : vector<2x1xi32>
    %490 = arith.extui %489 : vector<2x1xi1> to vector<2x1xi32>
    %491 = arith.sitofp %490 : vector<2x1xi32> to vector<2x1xf32>
    %492 = vector.broadcast %491 : vector<2x1xf32> to vector<2x64xf32>
    %493 = arith.mulf %492, %487 : vector<2x64xf32>
    %cst_78 = arith.constant 1.000000e+00 : f32
    %494 = vector.broadcast %cst_78 : f32 to vector<2x1xf32>
    %495 = arith.subf %494, %491 : vector<2x1xf32>
    %496 = vector.broadcast %495 : vector<2x1xf32> to vector<2x64xf32>
    %497 = arith.mulf %496, %434 : vector<2x64xf32>
    %498 = arith.addf %493, %497 : vector<2x64xf32>
    %499 = vector.broadcast %491 : vector<2x1xf32> to vector<2x64xf32>
    %500 = arith.mulf %499, %498 : vector<2x64xf32>
    %501 = vector.extract_strided_slice %500 {offsets = [0, 0], sizes = [2, 32], strides = [1, 1]} : vector<2x64xf32> to vector<2x32xf32>
    %502 = arith.negf %501 : vector<2x32xf32>
    %503 = math.exp %502 : vector<2x32xf32>
    %cst_79 = arith.constant 1.000000e+00 : f32
    %504 = vector.broadcast %cst_79 : f32 to vector<2x32xf32>
    %505 = arith.addf %504, %503 : vector<2x32xf32>
    %506 = arith.divf %504, %505 : vector<2x32xf32>
    %507 = vector.extract_strided_slice %500 {offsets = [0, 32], sizes = [2, 32], strides = [1, 1]} : vector<2x64xf32> to vector<2x32xf32>
    %508 = arith.negf %507 : vector<2x32xf32>
    %509 = math.exp %508 : vector<2x32xf32>
    %cst_80 = arith.constant 1.000000e+00 : f32
    %510 = vector.broadcast %cst_80 : f32 to vector<2x32xf32>
    %511 = arith.addf %510, %509 : vector<2x32xf32>
    %512 = arith.divf %510, %511 : vector<2x32xf32>
    %513 = arith.addf %506, %512 : vector<2x32xf32>
    %cst_81 = arith.constant 5.000000e-01 : f32
    %514 = vector.broadcast %cst_81 : f32 to vector<2x32xf32>
    %515 = arith.mulf %514, %513 : vector<2x32xf32>
    %516 = tpu.concatenate %74, %138, %202, %266, %330, %394, %458, %515 in 1 : vector<2x32xf32>, vector<2x32xf32>, vector<2x32xf32>, vector<2x32xf32>, vector<2x32xf32>, vector<2x32xf32>, vector<2x32xf32>, vector<2x32xf32> -> vector<2x256xf32>
    %c0_82 = arith.constant 0 : index
    %c0_83 = arith.constant 0 : index
    %517 = vector.load %arg1[%c0_82, %c0_83] : memref<2x256xf32, #tpu.memory_space<vmem>>, vector<2x256xf32>
    %518 = arith.mulf %517, %516 : vector<2x256xf32>
    %c0_84 = arith.constant 0 : index
    %c0_85 = arith.constant 0 : index
    %519 = vector.load %arg7[%c0_84, %c0_85] : memref<2x256xf32, #tpu.memory_space<vmem>>, vector<2x256xf32>
    tpu.vector_store %arg7[%c0_84, %c0_85], %518 {strides = array<i32>} : memref<2x256xf32, #tpu.memory_space<vmem>>, vector<2x256xf32>,
    return
  }
  func.func @transform_0(%arg0: i32) -> (i32, i32) {
    %c0_i32 = arith.constant 0 : i32
    %c0_i32_0 = arith.constant 0 : i32
    %c0_i32_1 = arith.constant 0 : i32
    return %c0_i32, %c0_i32_0 : i32, i32
  }
  func.func @transform_1(%arg0: i32) -> (i32, i32) {
    %c0_i32 = arith.constant 0 : i32
    %c0_i32_0 = arith.constant 0 : i32
    %c0_i32_1 = arith.constant 0 : i32
    return %c0_i32, %c0_i32_0 : i32, i32
  }
  func.func @transform_2(%arg0: i32) -> (i32, i32) {
    %c0_i32 = arith.constant 0 : i32
    %c0_i32_0 = arith.constant 0 : i32
    %c0_i32_1 = arith.constant 0 : i32
    return %c0_i32, %c0_i32_0 : i32, i32
  }
  func.func @transform_3(%arg0: i32) -> (i32, i32) {
    %c0_i32 = arith.constant 0 : i32
    %c0_i32_0 = arith.constant 0 : i32
    %c0_i32_1 = arith.constant 0 : i32
    return %c0_i32, %c0_i32_0 : i32, i32
  }
  func.func @transform_4(%arg0: i32) -> (i32, i32) {
    %c0_i32 = arith.constant 0 : i32
    %c0_i32_0 = arith.constant 0 : i32
    %c0_i32_1 = arith.constant 0 : i32
    return %c0_i32, %c0_i32_0 : i32, i32
  }
  func.func @transform_5(%arg0: i32) -> (i32, i32) {
    %c0_i32 = arith.constant 0 : i32
    %c0_i32_0 = arith.constant 0 : i32
    %c0_i32_1 = arith.constant 0 : i32
    return %c0_i32, %c0_i32_0 : i32, i32
  }
  func.func @transform_6(%arg0: i32) -> (i32, i32) {
    %c0_i32 = arith.constant 0 : i32
    %c0_i32_0 = arith.constant 0 : i32
    %c0_i32_1 = arith.constant 0 : i32
    return %c0_i32, %c0_i32_0 : i32, i32
  }
}

</mosaic_0001>

<bundles_post_ra>
// kernel: tpu_custom_call.1
= control target key start
LH: loop header
LB: loop body
LE: loop exit
PB: predicated region body
PF: predicated region fallthrough
CT: control target
= control target key end

     0   :  { %11 = vsyncpa [#allocation3], 0  ;;  %s1994_s0 = inlined_call_operand.hbm [shape: f32[2,256], index: 0, kind: input, shape index: {}]   ;;  %s1995_s1 = inlined_call_operand.hbm [shape: f32[16,64], index: 1, kind: input, shape index: {}]   ;;  %s1996_s2 = inlined_call_operand.vmem [shape: s32[2,1], index: 2, kind: input, shape index: {}]   ;;  %s1997_s3 = inlined_call_operand.hbm [shape: bf16[64,256], index: 3, kind: input, shape index: {}]   ;;  %s1998_s4 = inlined_call_operand.hbm [shape: bf16[64,256], index: 4, kind: input, shape index: {}]   ;;  %s1999_s5 = inlined_call_operand.vmem [shape: f32[1,256], index: 5, kind: input, shape index: {}]   ;;  %s2000_s6 = inlined_call_operand.hbm [shape: f32[2,256], index: 6, kind: output, shape index: {}]  }
   0x1   :  { %12 = vsyncpa [#allocation6], 0 }
   0x2   :  { %13 = vsyncpa [#allocation9], 0 }
   0x3   :  { %14 = vsyncpa [#allocation4], 0  ;;  %s1611_s21 = smov [#allocation5]   ;;  %s1493_s25 = scalar_lea.hbm %s1995_s1, 256 }
   0x4   :  { %s30_s22 = sshll.u32 %s1611_s21, 4  ;;  %p1494_p0 = scmp.ne.s32.totalorder %s1995_s1, %s1493_s25  ;;  %s31_s22 = int_to_ptr.vmem [resolvable:$true] %s30_s22 }
   0x5   :  { %p1497_p1 = scmp.lt.u32.totalorder %s1493_s25, %s1995_s1 }
   0x7   :  { %p1499_p2 = pnand %p1497_p1, %p1494_p0 }
   0x9   :  { %1502 = shalt.err (!%p1499_p2)
}
   0xa   :  { %s1503_s30 = scalar_lea.vmem %s31_s22, 256  ;;  %p1508_p4 = scmp.lt.s32.totalorder %s31_s22, %s31_s22 }
   0xb   :  { %p1504_p3 = scmp.ne.s32.totalorder %s31_s22, %s1503_s30  ;;  %p1509_p5 = scmp.lt.s32.totalorder %s1503_s30, %s1503_s30 }
   0xd   :  { %p1510_p6 = por %p1509_p5, %p1508_p4 }
   0xf   :  { %p1511_p7 = pnand %p1510_p6, %p1504_p3 }
  0x11   :  { %1514 = shalt.err (!%p1511_p7)
}
  0x12   :  { %s1612_s7 = smov 128   ;;  %s1613_s8 = smov 8  }
  0x13   :  { %36 = dma.hbm_to_vmem [thread:$0]  %s1995_s1, 256, %s31_s22, [#allocation6], %s1612_s7, %s1612_s7, %s1613_s8  }
  0x14   :  { %s1614_s11 = smov [#allocation2]   ;;  %s1615_s13 = smov [#allocation7]  }
  0x15   :  { %s21_s12 = sshll.u32 %s1614_s11, 4  ;;  %s44_s14 = sshll.u32 %s1615_s13, 4  ;;  %s22_s12 = int_to_ptr.vmem [resolvable:$true] %s21_s12  ;;  %s45_s14 = int_to_ptr.vmem [resolvable:$true] %s44_s14 }
  0x16   :  { %s1515_s17 = scalar_lea.hbm %s1994_s0, 64 }
  0x17   :  { %p1516_p8 = scmp.ne.s32.totalorder %s1994_s0, %s1515_s17  ;;  %p1519_p9 = scmp.lt.u32.totalorder %s1515_s17, %s1994_s0 }
  0x19   :  { %p1521_p10 = pnand %p1519_p9, %p1516_p8 }
  0x1b   :  { %1524 = shalt.err (!%p1521_p10)
}
  0x1c   :  { %s1525_s1 = scalar_lea.vmem %s22_s12, 64  ;;  %p1530_p12 = scmp.lt.s32.totalorder %s22_s12, %s22_s12 }
  0x1d   :  { %p1526_p11 = scmp.ne.s32.totalorder %s22_s12, %s1525_s1  ;;  %p1531_p13 = scmp.lt.s32.totalorder %s1525_s1, %s1525_s1 }
  0x1f   :  { %p1532_p0 = por %p1531_p13, %p1530_p12 }
  0x21   :  { %p1533_p1 = pnand %p1532_p0, %p1526_p11 }
  0x23   :  { %1536 = shalt.err (!%p1533_p1)
}
  0x24   :  { %24 = dma.hbm_to_vmem [thread:$0]  %s1994_s0, 64, %s22_s12, [#allocation3]  }
  0x25   :  { %s1537_s26 = scalar_lea.hbm %s1997_s3, 1024 }
  0x26   :  { %p1538_p2 = scmp.ne.s32.totalorder %s1997_s3, %s1537_s26  ;;  %p1541_p3 = scmp.lt.u32.totalorder %s1537_s26, %s1997_s3 }
  0x28   :  { %p1543_p4 = pnand %p1541_p3, %p1538_p2 }
  0x2a   :  { %1546 = shalt.err (!%p1543_p4)
}
  0x2b   :  { %s1547_s9 = scalar_lea.vmem %s45_s14, 1024  ;;  %p1552_p6 = scmp.lt.s32.totalorder %s45_s14, %s45_s14 }
  0x2c   :  { %p1548_p5 = scmp.ne.s32.totalorder %s45_s14, %s1547_s9  ;;  %p1553_p7 = scmp.lt.s32.totalorder %s1547_s9, %s1547_s9 }
  0x2e   :  { %p1554_p8 = por %p1553_p7, %p1552_p6 }
  0x30   :  { %p1555_p9 = pnand %p1554_p8, %p1548_p5 }
  0x32   :  { %1558 = shalt.err (!%p1555_p9)
}
  0x33   :  { %50 = dma.hbm_to_vmem [thread:$0]  %s1997_s3, 1024, %s45_s14, [#allocation6], %s1612_s7, %s1612_s7, %s1613_s8  }
  0x34   :  { %s1616_s11 = smov [#allocation8]   ;;  %s1559_s16 = scalar_lea.hbm %s1998_s4, 1024 }
  0x35   :  { %s56_s12 = sshll.u32 %s1616_s11, 4  ;;  %p1560_p10 = scmp.ne.s32.totalorder %s1998_s4, %s1559_s16  ;;  %s57_s12 = int_to_ptr.vmem [resolvable:$true] %s56_s12 }
  0x36   :  { %p1563_p11 = scmp.lt.u32.totalorder %s1559_s16, %s1998_s4 }
  0x38   :  { %p1565_p12 = pnand %p1563_p11, %p1560_p10 }
  0x3a   :  { %1568 = shalt.err (!%p1565_p12)
}
  0x3b   :  { %s1569_s21 = scalar_lea.vmem %s57_s12, 1024  ;;  %p1574_p0 = scmp.lt.s32.totalorder %s57_s12, %s57_s12 }
  0x3c   :  { %p1570_p13 = scmp.ne.s32.totalorder %s57_s12, %s1569_s21  ;;  %p1575_p1 = scmp.lt.s32.totalorder %s1569_s21, %s1569_s21 }
  0x3e   :  { %p1576_p2 = por %p1575_p1, %p1574_p0 }
  0x40   :  { %p1577_p3 = pnand %p1576_p2, %p1570_p13 }
  0x42   :  { %1580 = shalt.err (!%p1577_p3)
}
  0x43   :  { %62 = dma.hbm_to_vmem [thread:$0]  %s1998_s4, 1024, %s57_s12, [#allocation9], %s1612_s7, %s1612_s7, %s1613_s8  }
  0x44   :  { %1603 = dma.done.wait [#allocation3], 64  }
  0x45   :  { %1604 = vsyncadd [#allocation3], 4294967232 }
  0x46   :  { %1605 = dma.done.wait [#allocation6], 1280  }
  0x47   :  { %1606 = vsyncadd [#allocation6], 4294966016 }
  0x48   :  { %1607 = dma.done.wait [#allocation9], 1024  }
  0x49   :  { %1608 = vsyncadd [#allocation9], 4294966272  ;;  %v1617_v0 = vmov 0   ;;  %v1341_v1 = vld [vmem:[#allocation7 + $0x4] ss:$8 sps:$4 sm:$0xff]   ;;  %v79_v17 = vld [vmem:[#allocation5] sm:$0xff]  ;;  %v92_v24 = vlaneseq }
  0x4a   :  { %178 = vmatprep.mubr.bf16.mxu0 %v1617_v0  ;;  %272 = vmatprep.mubr.bf16.mxu1 %v1617_v0  ;;  %v1720_v2 = vld [vmem:[#allocation8 + $0x4] ss:$8 sps:$4 sm:$0xff]   ;;  %v1345_v3 = vld [vmem:[#allocation7] ss:$8 sps:$4 sm:$0xff]   ;;  %v1347_v5 = vld [vmem:[#allocation7 + $0x14] ss:$8 sps:$4 sm:$0xff]  }
  0x4b   :  { %1340 = vset.pattern.permute.xlu1 %v1617_v0  ;;  %1339 = vset.pattern.permute.xlu0 %v1617_v0  ;;  %v1722_v4 = vld [vmem:[#allocation8] ss:$8 sps:$4 sm:$0xff]   ;;  %v1726_v6 = vld [vmem:[#allocation8 + $0x14] ss:$8 sps:$4 sm:$0xff]   ;;  %v1351_v7 = vld [vmem:[#allocation7 + $0x10] ss:$8 sps:$4 sm:$0xff]  }
  0x4c   :  { %146 = vmatprep.subr.bf16.mxu0 %v1341_v1  ;;  %240 = vmatprep.subr.bf16.mxu1 %v1720_v2  ;;  %v1728_v8 = vld [vmem:[#allocation8 + $0x10] ss:$8 sps:$4 sm:$0xff]   ;;  %v1353_v9 = vld [vmem:[#allocation7 + $0x24] ss:$8 sps:$4 sm:$0xff]   ;;  %v1357_v11 = vld [vmem:[#allocation7 + $0x20] ss:$8 sps:$4 sm:$0xff]  }
  0x4d   :  { %147 = vmatpush1.bf16.msra.mxu0 %v1345_v3  ;;  %241 = vmatpush1.bf16.msra.mxu1 %v1722_v4  ;;  %v1731_v10 = vld [vmem:[#allocation8 + $0x24] ss:$8 sps:$4 sm:$0xff]   ;;  %v1733_v12 = vld [vmem:[#allocation8 + $0x20] ss:$8 sps:$4 sm:$0xff]   ;;  %v1359_v13 = vld [vmem:[#allocation7 + $0x34] ss:$8 sps:$4 sm:$0xff]  }
  0x4e   :  { %148 = vmatprep.subr.bf16.mxu0 %v1347_v5  ;;  %242 = vmatprep.subr.bf16.mxu1 %v1726_v6  ;;  %v1737_v14 = vld [vmem:[#allocation8 + $0x34] ss:$8 sps:$4 sm:$0xff]   ;;  %v1363_v15 = vld [vmem:[#allocation7 + $0x30] ss:$8 sps:$4 sm:$0xff]   ;;  %vm142_vm0 = vcmask 523264   ;;  %v1618_v21 = vmov 0.0  }
  0x4f   :  { %v1740_v16 = vld [vmem:[#allocation8 + $0x30] ss:$8 sps:$4 sm:$0xff]   ;;  %v1769_v20 = vld [vmem:[%s1996_s2] sm:$0x3]  ;;  %v1773_v25 = vshrl.u32 %v92_v24, 7  ;;  %s1619_s2 = smov 64  }
  0x50   :  { %v80_v18 = vld [vmem:[#allocation5 + $0x8] sm:$0xff]  ;;  %vm305_vm1 = vcmp.gt.s32.totalorder %v1769_v20, 0  ;;  %v90_v27 = vld [vmem:[%s1999_s5] sm:$0x3]  ;;  %vm418_vm2 = vcmp.gt.s32.totalorder %v1769_v20, 1  ;;  %vm549_vm3 = vcmp.gt.s32.totalorder %v1769_v20, 2 }
  0x51   :  { %149 = vmatpush1.bf16.msra.mxu0 %v1351_v7  ;;  %243 = vmatpush1.bf16.msra.mxu1 %v1728_v8  ;;  %v81_v19 = vpack.c.bf16 %v80_v18, %v79_v17  ;;  %v1289_v22 = vsel %vm305_vm1, 1.0, %v1618_v21  ;;  %v94_v26 = vsub.s32 0, %v1773_v25  ;;  %v98_v29 = vsub.s32 1, %v1773_v25  ;;  %s1620_s5 = smov 96   ;;  %s1621_s22 = smov 32  }
  0x52   :  { %150 = vmatprep.subr.bf16.mxu0 %v1353_v9  ;;  %244 = vmatprep.subr.bf16.mxu1 %v1731_v10  ;;  %v314_v23 = vsub.f32 1.0, %v1289_v22  ;;  %v1294_v51 = vsel %vm418_vm2, 1.0, %v1618_v21  ;;  %vm672_vm4 = vcmp.gt.s32.totalorder %v1769_v20, 3  ;;  %vm788_vm5 = vcmp.gt.s32.totalorder %v1769_v20, 4  ;;  %s1623_s23 = smov [#allocation10]  }
  0x53   :  { %v95_v28 = vrot.slane %v90_v27, %v94_v26  ;;  %v99_v35 = vrot.slane %v90_v27, %v98_v29  ;;  %v432_v52 = vsub.f32 1.0, %v1294_v51  ;;  %vm910_vm6 = vcmp.gt.s32.totalorder %v1769_v20, 5  ;;  %s1259_s24 = sshll.u32 %s1623_s23, 4  ;;  %s1260_s24 = int_to_ptr.vmem [resolvable:$true] %s1259_s24 }
  0x54   :  { %317 = vperm.xlu1 %1340, %v314_v23   ;;  %vm1041_vm7 = vcmp.gt.s32.totalorder %v1769_v20, 6  ;;  %vm1164_vm8 = vcmp.gt.s32.totalorder %v1769_v20, 7  ;;  %vm1231_vm9 = vcmask 261120   ;;  %vm1234_vm10 = vcmask 785408   ;;  %s1581_s25 = scalar_lea.vmem %s1260_s24, 64  ;;  %p1586_p5 = scmp.lt.s32.totalorder %s1260_s24, %s1260_s24 }
  0x55   :  { %151 = vmatpush1.bf16.msra.mxu0 %v1357_v11  ;;  %245 = vmatpush1.bf16.msra.mxu1 %v1733_v12  ;;  %p1582_p4 = scmp.ne.s32.totalorder %s1260_s24, %s1581_s25  ;;  %p1587_p6 = scmp.lt.s32.totalorder %s1581_s25, %s1581_s25 }
  0x56   :  { %152 = vmatprep.subr.bf16.mxu0 %v1359_v13  ;;  %246 = vmatprep.subr.bf16.mxu1 %v1737_v14 }
  0x57   :  { %p1588_p7 = por %p1587_p6, %p1586_p5 }
  0x59   :  { %153 = vmatpush1.bf16.msra.mxu0 %v1363_v15  ;;  %247 = vmatpush1.bf16.msra.mxu1 %v1740_v16  ;;  %p1589_p8 = pnand %p1588_p7, %p1582_p4 }
  0x5a   :  { %344 = vmatprep.subr.bf16.mxu0 %v1720_v2  ;;  %473 = vmatprep.subr.bf16.mxu1 %v1720_v2 }
  0x5c   :  { %1278 = vmatmul.mubr.msk.bf16.vlgmr.msra.gmra.mrb[0].mxu0 %vm142_vm0, %v81_v19  ;;  %273 = vmatmul.mubr.bf16.vlgmr.msra.gmra.mrb[0].mxu1 %v1617_v0 }
  0x5d   :  { %345 = vmatpush1.bf16.msra.mxu0 %v1722_v4  ;;  %376 = vmatprep.mubr.bf16.mxu0 %v1617_v0 }
  0x5e   :  { %346 = vmatprep.subr.bf16.mxu0 %v1726_v6  ;;  %474 = vmatpush1.bf16.msra.mxu1 %v1722_v4 }
  0x5f   :  { %475 = vmatprep.subr.bf16.mxu1 %v1726_v6  ;;  %505 = vmatprep.mubr.bf16.mxu1 %v1617_v0 }
  0x61   :  { %347 = vmatpush1.bf16.msra.mxu0 %v1728_v8 }
  0x62   :  { %348 = vmatprep.subr.bf16.mxu0 %v1731_v10  ;;  %476 = vmatpush1.bf16.msra.mxu1 %v1728_v8 }
  0x63   :  { %477 = vmatprep.subr.bf16.mxu1 %v1731_v10 }
  0x65   :  { %349 = vmatpush1.bf16.msra.mxu0 %v1733_v12 }
  0x66   :  { %350 = vmatprep.subr.bf16.mxu0 %v1737_v14  ;;  %478 = vmatpush1.bf16.msra.mxu1 %v1733_v12 }
  0x67   :  { %479 = vmatprep.subr.bf16.mxu1 %v1737_v14 }
  0x69   :  { %351 = vmatpush1.bf16.msra.mxu0 %v1740_v16 }
  0x6a   :  { %480 = vmatpush1.bf16.msra.mxu1 %v1740_v16  ;;  %596 = vmatprep.subr.bf16.mxu0 %v1720_v2 }
  0x6b   :  { %719 = vmatprep.subr.bf16.mxu1 %v1720_v2 }
  0xd3   :  { %v318_v61 = vpop.permute.xlu1 %317 }
  0xd4   :  { %v320_v63 = vmul.f32 0.0, %v318_v61 }
 0x12f   :  { %v180_v30 = vpop.f32.mrb[0].mxu0  ;;  %v274_v31 = vpop.f32.mrb[0].mxu1 }
 0x130   :  { %v1780_v32 = vadd.f32 %v180_v30, %v95_v28  ;;  %v182_v33 = vpop.f32.mrb[1].mxu0  ;;  %v276_v34 = vpop.f32.mrb[1].mxu1 }
 0x131   :  { %v184_v36 = vpop.f32.mrb[2].mxu0  ;;  %v278_v37 = vpop.f32.mrb[2].mxu1  ;;  %v1787_v44 = vadd.f32 %v182_v33, %v99_v35 }
 0x132   :  { %v281_v38 = vadd.f32 %v274_v31, %v1780_v32  ;;  %v1783_v39 = vadd.f32 %v184_v36, %v95_v28  ;;  %v186_v40 = vpop.f32.mrb[3].mxu0  ;;  %v279_v41 = vpop.f32.mrb[3].mxu1 }
 0x133   :  { %v1785_v42 = vadd.f32 %v186_v40, %v99_v35  ;;  %v282_v45 = vadd.f32 %v276_v34, %v1787_v44 }
 0x134   :  { %v1287_v43 = vmul.f32 -1.442695, %v281_v38 }
 0x135   :  { %v1288_v53 = vmul.f32 -1.442695, %v282_v45 }
 0x136   :  { %1365 = vpow2.f32 %v1287_v43 }
 0x137   :  { %1367 = vtanh.f32 %v282_v45 }
 0x140   :  { %v1366_v46 = vpop.eup %1365 }
 0x141   :  { %v286_v47 = vadd.f32 1.0, %v1366_v46  ;;  %v1368_v48 = vpop.eup %1367 }
 0x143   :  { %1369 = vrcp.f32 %v286_v47 }
 0x144   :  { %1371 = vpow2.f32 %v1288_v53 }
 0x14d   :  { %v1370_v49 = vpop.eup %1369 }
 0x14e   :  { %v297_v50 = vmul.f32 %v1370_v49, %v1368_v48  ;;  %v1372_v54 = vpop.eup %1371  ;;  %v296_v56 = vmul.f32 0.0, %v1370_v49 }
 0x14f   :  { %v293_v55 = vadd.f32 1.0, %v1372_v54 }
 0x150   :  { %299 = vrot.lane.b32.xlu0 %v297_v50, %s1619_s2 }
 0x151   :  { %1373 = vrcp.f32 %v293_v55 }
 0x154   :  { %310 = vperm.xlu0 %1339, %v1289_v22  }
 0x158   :  { %435 = vperm.xlu0 %1339, %v432_v52  }
 0x15b   :  { %v1374_v59 = vpop.eup %1373 }
 0x1c2   :  { %v300_v57 = vpop.permute.xlu0 %299 }
 0x1c3   :  { %v302_v58 = vadd.f32 %v300_v57, %v296_v56 }
 0x1c5   :  { %1375 = vtanh.f32 %v302_v58 }
 0x1cf   :  { %v1376_v60 = vpop.eup %1375 }
 0x1d0   :  { %v304_v62 = vmul.f32 %v1376_v60, %v1374_v59 }
 0x1d3   :  { %v311_v1 = vpop.permute.xlu0 %310 }
 0x1d4   :  { %v313_v3 = vmul.f32 %v311_v1, %v304_v62  ;;  %v322_v5 = vmul.f32 %v311_v1, %v302_v58 }
 0x1d6   :  { %v321_v7 = vadd.f32 %v320_v63, %v313_v3  ;;  %v323_v9 = vadd.f32 %v322_v5, %v320_v63 }
 0x1d7   :  { %v436_v37 = vpop.permute.xlu0 %435 }
 0x1d8   :  { %v1793_v11 = vmul.f32 %v321_v7, %v311_v1  ;;  %v337_v13 = vpack.c.bf16 %v321_v7, %v321_v7  ;;  %v407_v33 = vrot.slane %v323_v9, 6  ;;  %v438_v38 = vmul.f32 %v436_v37, %v321_v7 }
 0x1d9   :  { %v450_v40 = vmul.f32 %v436_v37, %v323_v9  ;;  %v1299_v1 = vsel %vm549_vm3, 1.0, %v1618_v21 }
 0x1da   :  { %339 = vrot.lane.b32.xlu1 %v337_v13, %s1619_s2 }
 0x24c   :  { %v340_v15 = vpop.permute.xlu1 %339 }
 0x24d   :  { %1291 = vmatmul.mubr.msk.bf16.vlgmr.msra.gmra.mrb[4].mxu0 %vm142_vm0, %v340_v15 }
 0x24e   :  { %597 = vmatpush1.bf16.msra.mxu0 %v1722_v4  ;;  %628 = vmatprep.mubr.bf16.mxu0 %v1617_v0 }
 0x24f   :  { %598 = vmatprep.subr.bf16.mxu0 %v1726_v6 }
 0x252   :  { %599 = vmatpush1.bf16.msra.mxu0 %v1728_v8 }
 0x253   :  { %600 = vmatprep.subr.bf16.mxu0 %v1731_v10 }
 0x256   :  { %601 = vmatpush1.bf16.msra.mxu0 %v1733_v12 }
 0x257   :  { %602 = vmatprep.subr.bf16.mxu0 %v1737_v14 }
 0x25a   :  { %603 = vmatpush1.bf16.msra.mxu0 %v1740_v16 }
 0x25b   :  { %836 = vmatprep.subr.bf16.mxu0 %v1720_v2 }
 0x320   :  { %v378_v17 = vpop.f32.mrb[4].mxu0 }
 0x321   :  { %v387_v18 = vrot.slane %v378_v17, 6  ;;  %v380_v19 = vpop.f32.mrb[5].mxu0 }
 0x322   :  { %v382_v22 = vpop.f32.mrb[6].mxu0  ;;  %v388_v27 = vrot.slane %v380_v19, 6 }
 0x323   :  { %v391_v23 = vadd.f32 %v387_v18, %v1780_v32  ;;  %v383_v24 = vpop.f32.mrb[7].mxu0 }
 0x324   :  { %v392_v28 = vadd.f32 %v388_v27, %v1787_v44 }
 0x325   :  { %v1292_v26 = vmul.f32 -1.442695, %v391_v23 }
 0x326   :  { %v1293_v41 = vmul.f32 -1.442695, %v392_v28 }
 0x327   :  { %1377 = vpow2.f32 %v1292_v26 }
 0x328   :  { %1379 = vtanh.f32 %v392_v28  ;;  %v563_v28 = vsub.f32 1.0, %v1299_v1 }
 0x331   :  { %v1378_v29 = vpop.eup %1377 }
 0x332   :  { %v396_v30 = vadd.f32 1.0, %v1378_v29  ;;  %v1380_v31 = vpop.eup %1379 }
 0x334   :  { %1381 = vrcp.f32 %v396_v30 }
 0x335   :  { %1383 = vpow2.f32 %v1293_v41 }
 0x33e   :  { %v1382_v34 = vpop.eup %1381 }
 0x33f   :  { %v410_v35 = vmul.f32 %v1382_v34, %v1380_v31  ;;  %v409_v36 = vmul.f32 %v1382_v34, %v407_v33  ;;  %v1384_v43 = vpop.eup %1383 }
 0x340   :  { %v403_v45 = vadd.f32 1.0, %v1384_v43 }
 0x341   :  { %412 = vrot.lane.b32.xlu1 %v410_v35, %s1619_s2 }
 0x342   :  { %1385 = vrcp.f32 %v403_v45 }
 0x345   :  { %423 = vperm.xlu1 %1340, %v1294_v51  }
 0x349   :  { %440 = vrot.lane.b32.xlu1 %v438_v38, %s1619_s2 }
 0x34c   :  { %v1386_v48 = vpop.eup %1385 }
 0x34d   :  { %452 = vrot.lane.b32.xlu1 %v450_v40, %s1619_s2 }
 0x3b3   :  { %v413_v46 = vpop.permute.xlu1 %412 }
 0x3b4   :  { %v415_v47 = vadd.f32 %v413_v46, %v409_v36 }
 0x3b6   :  { %1387 = vtanh.f32 %v415_v47  ;;  %v445_v51 = vrot.slane %v415_v47, 2 }
 0x3c0   :  { %v1388_v49 = vpop.eup %1387 }
 0x3c1   :  { %v417_v50 = vmul.f32 %v1388_v49, %v1386_v48 }
 0x3c3   :  { %v427_v52 = vrot.slane %v417_v50, 2 }
 0x3c4   :  { %v1813_v53 = vpop.permute.xlu1 %423 }
 0x3c5   :  { %428 = vrot.lane.b32.xlu0 %v427_v52, %s1619_s2 }
 0x3c8   :  { %v441_v54 = vpop.permute.xlu1 %440 }
 0x3c9   :  { %446 = vrot.lane.b32.xlu0 %v445_v51, %s1619_s2  ;;  %v1304_v51 = vsel %vm672_vm4, 1.0, %v1618_v21 }
 0x3cc   :  { %v453_v61 = vpop.permute.xlu1 %452 }
 0x437   :  { %v429_v55 = vpop.permute.xlu0 %428 }
 0x438   :  { %v431_v56 = vmul.f32 %v429_v55, %v1813_v53 }
 0x43a   :  { %v1816_v57 = vadd.f32 %v441_v54, %v431_v56 }
 0x43b   :  { %v447_v58 = vpop.permute.xlu0 %446 }
 0x43c   :  { %v469_v59 = vpack.c.bf16 %v1816_v57, %v1816_v57  ;;  %v449_v60 = vmul.f32 %v447_v58, %v1813_v53 }
 0x43e   :  { %v455_v62 = vadd.f32 %v453_v61, %v449_v60  ;;  %1296 = vmatmul.mubr.msk.bf16.vlgmr.msra.gmra.mrb[4].mxu1 %vm142_vm0, %v469_v59 }
 0x43f   :  { %720 = vmatpush1.bf16.msra.mxu1 %v1722_v4  ;;  %751 = vmatprep.mubr.bf16.mxu1 %v1617_v0 }
 0x440   :  { %v536_v63 = vrot.slane %v455_v62, 4  ;;  %721 = vmatprep.subr.bf16.mxu1 %v1726_v6 }
 0x442   :  { %537 = vrot.lane.b32.xlu0 %v536_v63, %s1619_s2 }
 0x443   :  { %722 = vmatpush1.bf16.msra.mxu1 %v1728_v8 }
 0x444   :  { %723 = vmatprep.subr.bf16.mxu1 %v1731_v10 }
 0x446   :  { %554 = vperm.xlu0 %1339, %v1299_v1  }
 0x447   :  { %724 = vmatpush1.bf16.msra.mxu1 %v1733_v12 }
 0x448   :  { %725 = vmatprep.subr.bf16.mxu1 %v1737_v14 }
 0x44b   :  { %726 = vmatpush1.bf16.msra.mxu1 %v1740_v16 }
 0x44c   :  { %965 = vmatprep.subr.bf16.mxu1 %v1720_v2 }
 0x4b4   :  { %v538_v31 = vpop.permute.xlu0 %537 }
 0x4c5   :  { %v1839_v46 = vpop.permute.xlu0 %554 }
 0x511   :  { %v507_v3 = vpop.f32.mrb[4].mxu1 }
 0x512   :  { %v516_v5 = vrot.slane %v507_v3, 4  ;;  %v509_v7 = vpop.f32.mrb[5].mxu1 }
 0x513   :  { %v511_v9 = vpop.f32.mrb[6].mxu1  ;;  %v517_v18 = vrot.slane %v509_v7, 4 }
 0x514   :  { %v520_v13 = vadd.f32 %v516_v5, %v1780_v32  ;;  %v512_v15 = vpop.f32.mrb[7].mxu1 }
 0x515   :  { %v521_v19 = vadd.f32 %v517_v18, %v1787_v44 }
 0x516   :  { %v1297_v17 = vmul.f32 -1.442695, %v520_v13 }
 0x517   :  { %v1298_v29 = vmul.f32 -1.442695, %v521_v19 }
 0x518   :  { %1389 = vpow2.f32 %v1297_v17 }
 0x519   :  { %1391 = vtanh.f32 %v521_v19 }
 0x522   :  { %v1390_v22 = vpop.eup %1389 }
 0x523   :  { %v525_v23 = vadd.f32 1.0, %v1390_v22  ;;  %v1392_v24 = vpop.eup %1391 }
 0x525   :  { %1393 = vrcp.f32 %v525_v23 }
 0x526   :  { %1395 = vpow2.f32 %v1298_v29 }
 0x52f   :  { %v1394_v26 = vpop.eup %1393 }
 0x530   :  { %v541_v27 = vmul.f32 %v1394_v26, %v1392_v24  ;;  %v1396_v30 = vpop.eup %1395  ;;  %v540_v34 = vmul.f32 %v1394_v26, %v538_v31 }
 0x531   :  { %v532_v33 = vadd.f32 1.0, %v1396_v30 }
 0x532   :  { %543 = vrot.lane.b32.xlu1 %v541_v27, %s1619_s2 }
 0x533   :  { %1397 = vrcp.f32 %v532_v33  ;;  %v1309_v33 = vsel %vm788_vm5, 1.0, %v1618_v21 }
 0x536   :  { %566 = vperm.xlu1 %1340, %v563_v28  }
 0x53d   :  { %v1398_v38 = vpop.eup %1397 }
 0x5a4   :  { %v544_v35 = vpop.permute.xlu1 %543 }
 0x5a5   :  { %v546_v36 = vadd.f32 %v544_v35, %v540_v34  ;;  %v797_v35 = vsub.f32 1.0, %v1309_v33 }
 0x5a7   :  { %1399 = vtanh.f32 %v546_v36  ;;  %v572_v37 = vrot.slane %v546_v36, 4 }
 0x5a9   :  { %573 = vrot.lane.b32.xlu1 %v572_v37, %s1619_s2 }
 0x5b1   :  { %v1400_v40 = vpop.eup %1399 }
 0x5b2   :  { %v548_v41 = vmul.f32 %v1400_v40, %v1398_v38 }
 0x5b4   :  { %v558_v43 = vrot.slane %v548_v41, 4 }
 0x5b5   :  { %v567_v45 = vpop.permute.xlu1 %566 }
 0x5b6   :  { %559 = vrot.lane.b32.xlu0 %v558_v43, %s1619_s2  ;;  %v577_v48 = vmul.f32 %v567_v45, %v455_v62  ;;  %v569_v55 = vmul.f32 %v567_v45, %v1816_v57 }
 0x61b   :  { %v574_v47 = vpop.permute.xlu1 %573 }
 0x61c   :  { %v576_v49 = vmul.f32 %v574_v47, %v1839_v46 }
 0x61e   :  { %v1842_v50 = vadd.f32 %v577_v48, %v576_v49 }
 0x620   :  { %v659_v52 = vrot.slane %v1842_v50, 2 }
 0x622   :  { %660 = vrot.lane.b32.xlu0 %v659_v52, %s1619_s2 }
 0x626   :  { %677 = vperm.xlu0 %1339, %v1304_v51  }
 0x628   :  { %v560_v54 = vpop.permute.xlu0 %559 }
 0x629   :  { %v562_v56 = vmul.f32 %v560_v54, %v1839_v46 }
 0x62b   :  { %v1850_v58 = vadd.f32 %v569_v55, %v562_v56 }
 0x62d   :  { %v592_v59 = vpack.c.bf16 %v1850_v58, %v1850_v58 }
 0x62f   :  { %1301 = vmatmul.mubr.msk.bf16.vlgmr.msra.gmra.mrb[8].mxu0 %vm142_vm0, %v592_v59 }
 0x630   :  { %837 = vmatpush1.bf16.msra.mxu0 %v1722_v4  ;;  %868 = vmatprep.mubr.bf16.mxu0 %v1617_v0 }
 0x631   :  { %838 = vmatprep.subr.bf16.mxu0 %v1726_v6 }
 0x634   :  { %839 = vmatpush1.bf16.msra.mxu0 %v1728_v8 }
 0x635   :  { %840 = vmatprep.subr.bf16.mxu0 %v1731_v10 }
 0x638   :  { %841 = vmatpush1.bf16.msra.mxu0 %v1733_v12 }
 0x639   :  { %842 = vmatprep.subr.bf16.mxu0 %v1737_v14 }
 0x63c   :  { %843 = vmatpush1.bf16.msra.mxu0 %v1740_v16 }
 0x63d   :  { %1088 = vmatprep.subr.bf16.mxu0 %v1720_v2  ;;  %v686_v2 = vsub.f32 1.0, %v1304_v51 }
 0x694   :  { %v661_v23 = vpop.permute.xlu0 %660 }
 0x6a5   :  { %v678_v37 = vpop.permute.xlu0 %677 }
 0x702   :  { %v630_v60 = vpop.f32.mrb[8].mxu0 }
 0x703   :  { %v639_v61 = vrot.slane %v630_v60, 2  ;;  %v632_v62 = vpop.f32.mrb[9].mxu0 }
 0x704   :  { %v634_v63 = vpop.f32.mrb[10].mxu0  ;;  %v640_v7 = vrot.slane %v632_v62, 2 }
 0x705   :  { %v643_v1 = vadd.f32 %v639_v61, %v1780_v32  ;;  %v635_v3 = vpop.f32.mrb[11].mxu0 }
 0x706   :  { %v644_v9 = vadd.f32 %v640_v7, %v1787_v44 }
 0x707   :  { %v1302_v5 = vmul.f32 -1.442695, %v643_v1 }
 0x708   :  { %v1303_v22 = vmul.f32 -1.442695, %v644_v9 }
 0x709   :  { %1401 = vpow2.f32 %v1302_v5 }
 0x70a   :  { %1403 = vtanh.f32 %v644_v9 }
 0x713   :  { %v1402_v13 = vpop.eup %1401 }
 0x714   :  { %v648_v15 = vadd.f32 1.0, %v1402_v13  ;;  %v1404_v17 = vpop.eup %1403  ;;  %v1314_v13 = vsel %vm910_vm6, 1.0, %v1618_v21 }
 0x716   :  { %1405 = vrcp.f32 %v648_v15 }
 0x717   :  { %1407 = vpow2.f32 %v1303_v22 }
 0x720   :  { %v1406_v18 = vpop.eup %1405 }
 0x721   :  { %v664_v19 = vmul.f32 %v1406_v18, %v1404_v17  ;;  %v1408_v32 = vpop.eup %1407  ;;  %v663_v26 = vmul.f32 %v1406_v18, %v661_v23  ;;  %v924_v17 = vsub.f32 1.0, %v1314_v13 }
 0x722   :  { %v655_v24 = vadd.f32 1.0, %v1408_v32 }
 0x723   :  { %666 = vrot.lane.b32.xlu1 %v664_v19, %s1619_s2 }
 0x724   :  { %1409 = vrcp.f32 %v655_v24 }
 0x727   :  { %689 = vperm.xlu1 %1340, %v686_v2  }
 0x72e   :  { %v1410_v29 = vpop.eup %1409 }
 0x795   :  { %v667_v27 = vpop.permute.xlu1 %666 }
 0x796   :  { %v669_v28 = vadd.f32 %v667_v27, %v663_v26 }
 0x798   :  { %1411 = vtanh.f32 %v669_v28  ;;  %v695_v44 = vrot.slane %v669_v28, 6 }
 0x79a   :  { %696 = vrot.lane.b32.xlu1 %v695_v44, %s1619_s2 }
 0x7a2   :  { %v1412_v30 = vpop.eup %1411 }
 0x7a3   :  { %v671_v31 = vmul.f32 %v1412_v30, %v1410_v29 }
 0x7a5   :  { %v681_v34 = vrot.slane %v671_v31, 6 }
 0x7a6   :  { %v690_v36 = vpop.permute.xlu1 %689 }
 0x7a7   :  { %682 = vrot.lane.b32.xlu0 %v681_v34, %s1619_s2  ;;  %v700_v40 = vmul.f32 %v690_v36, %v1842_v50  ;;  %v692_v47 = vmul.f32 %v690_v36, %v1850_v58 }
 0x7ab   :  { %800 = vperm.xlu0 %1339, %v797_v35  }
 0x80c   :  { %v697_v38 = vpop.permute.xlu1 %696 }
 0x80d   :  { %v699_v41 = vmul.f32 %v697_v38, %v678_v37 }
 0x80f   :  { %v701_v43 = vadd.f32 %v700_v40, %v699_v41 }
 0x811   :  { %776 = vrot.lane.b32.xlu1 %v701_v43, %s1619_s2 }
 0x815   :  { %793 = vperm.xlu1 %1340, %v1309_v33  }
 0x819   :  { %v683_v45 = vpop.permute.xlu0 %682 }
 0x81a   :  { %v685_v48 = vmul.f32 %v683_v45, %v678_v37 }
 0x81c   :  { %v693_v49 = vadd.f32 %v692_v47, %v685_v48 }
 0x81e   :  { %v1874_v52 = vmul.f32 %v693_v49, %v678_v37  ;;  %v715_v51 = vpack.c.bf16 %v693_v49, %v693_v49 }
 0x820   :  { %1306 = vmatmul.mubr.msk.bf16.vlgmr.msra.gmra.mrb[8].mxu1 %vm142_vm0, %v715_v51 }
 0x821   :  { %966 = vmatpush1.bf16.msra.mxu1 %v1722_v4  ;;  %997 = vmatprep.mubr.bf16.mxu1 %v1617_v0 }
 0x822   :  { %967 = vmatprep.subr.bf16.mxu1 %v1726_v6 }
 0x825   :  { %968 = vmatpush1.bf16.msra.mxu1 %v1728_v8 }
 0x826   :  { %969 = vmatprep.subr.bf16.mxu1 %v1731_v10 }
 0x829   :  { %970 = vmatpush1.bf16.msra.mxu1 %v1733_v12 }
 0x82a   :  { %971 = vmatprep.subr.bf16.mxu1 %v1737_v14  ;;  %v801_v7 = vpop.permute.xlu0 %800 }
 0x82b   :  { %v803_v9 = vmul.f32 %v801_v7, %v693_v49  ;;  %v810_v15 = vmul.f32 %v801_v7, %v701_v43 }
 0x82d   :  { %972 = vmatpush1.bf16.msra.mxu1 %v1740_v16 }
 0x883   :  { %v777_v2 = vpop.permute.xlu1 %776 }
 0x894   :  { %v1892_v44 = vpop.permute.xlu1 %793 }
 0x8f3   :  { %v753_v50 = vpop.f32.mrb[8].mxu1 }
 0x8f4   :  { %v760_v54 = vadd.f32 %v753_v50, %v1783_v39  ;;  %v755_v55 = vpop.f32.mrb[9].mxu1 }
 0x8f5   :  { %v757_v56 = vpop.f32.mrb[10].mxu1  ;;  %v761_v61 = vadd.f32 %v755_v55, %v1785_v42 }
 0x8f6   :  { %v1307_v59 = vmul.f32 -1.442695, %v760_v54  ;;  %v758_v60 = vpop.f32.mrb[11].mxu1 }
 0x8f7   :  { %v1308_v18 = vmul.f32 -1.442695, %v761_v61 }
 0x8f8   :  { %1413 = vpow2.f32 %v1307_v59 }
 0x8f9   :  { %1415 = vtanh.f32 %v761_v61 }
 0x902   :  { %v1414_v62 = vpop.eup %1413 }
 0x903   :  { %v765_v63 = vadd.f32 1.0, %v1414_v62  ;;  %v1416_v1 = vpop.eup %1415 }
 0x905   :  { %1417 = vrcp.f32 %v765_v63 }
 0x906   :  { %1419 = vpow2.f32 %v1308_v18 }
 0x90f   :  { %v1418_v3 = vpop.eup %1417 }
 0x910   :  { %v780_v5 = vmul.f32 %v1418_v3, %v1416_v1  ;;  %v1420_v19 = vpop.eup %1419  ;;  %v779_v32 = vmul.f32 %v1418_v3, %v777_v2 }
 0x911   :  { %v772_v22 = vadd.f32 1.0, %v1420_v19 }
 0x912   :  { %782 = vrot.lane.b32.xlu0 %v780_v5, %s1619_s2 }
 0x913   :  { %1421 = vrcp.f32 %v772_v22 }
 0x916   :  { %805 = vrot.lane.b32.xlu0 %v803_v9, %s1619_s2 }
 0x91a   :  { %812 = vrot.lane.b32.xlu0 %v810_v15, %s1619_s2 }
 0x91d   :  { %v1422_v26 = vpop.eup %1421 }
 0x91e   :  { %927 = vperm.xlu0 %1339, %v924_v17  }
 0x984   :  { %v783_v23 = vpop.permute.xlu0 %782 }
 0x985   :  { %v785_v24 = vadd.f32 %v783_v23, %v779_v32 }
 0x987   :  { %1423 = vtanh.f32 %v785_v24 }
 0x988   :  { %v806_v30 = vpop.permute.xlu0 %805 }
 0x991   :  { %v1424_v27 = vpop.eup %1423 }
 0x992   :  { %v787_v28 = vmul.f32 %v1424_v27, %v1422_v26 }
 0x994   :  { %v796_v29 = vmul.f32 %v1892_v44, %v787_v28 }
 0x996   :  { %v1895_v31 = vadd.f32 %v806_v30, %v796_v29 }
 0x998   :  { %v829_v33 = vpack.c.bf16 %v1895_v31, %v1895_v31 }
 0x99a   :  { %831 = vrot.lane.b32.xlu1 %v829_v33, %s1619_s2 }
 0xa0c   :  { %v832_v34 = vpop.permute.xlu1 %831 }
 0xa0d   :  { %1311 = vmatmul.mubr.msk.bf16.vlgmr.msra.gmra.mrb[12].mxu0 %vm142_vm0, %v832_v34 }
 0xa0e   :  { %1089 = vmatpush1.bf16.msra.mxu0 %v1722_v4  ;;  %1120 = vmatprep.mubr.bf16.mxu0 %v1617_v0 }
 0xa0f   :  { %1090 = vmatprep.subr.bf16.mxu0 %v1726_v6 }
 0xa12   :  { %1091 = vmatpush1.bf16.msra.mxu0 %v1728_v8 }
 0xa13   :  { %1092 = vmatprep.subr.bf16.mxu0 %v1731_v10 }
 0xa16   :  { %1093 = vmatpush1.bf16.msra.mxu0 %v1733_v12  ;;  %v813_v12 = vpop.permute.xlu0 %812 }
 0xa17   :  { %1094 = vmatprep.subr.bf16.mxu0 %v1737_v14  ;;  %v809_v14 = vmul.f32 %v1892_v44, %v785_v24  ;;  %v1319_v24 = vsel %vm1041_vm7, 1.0, %v1618_v21 }
 0xa1a   :  { %1095 = vmatpush1.bf16.msra.mxu0 %v1740_v16  ;;  %v815_v16 = vadd.f32 %v813_v12, %v809_v14  ;;  %v928_v51 = vpop.permute.xlu0 %927 }
 0xa1b   :  { %v930_v50 = vmul.f32 %v928_v51, %v1895_v31 }
 0xa1c   :  { %v899_v45 = vrot.slane %v815_v16, 6  ;;  %v942_v54 = vmul.f32 %v928_v51, %v815_v16 }
 0xae0   :  { %v870_v35 = vpop.f32.mrb[12].mxu0 }
 0xae1   :  { %v879_v36 = vrot.slane %v870_v35, 6  ;;  %v872_v37 = vpop.f32.mrb[13].mxu0 }
 0xae2   :  { %v874_v38 = vpop.f32.mrb[14].mxu0  ;;  %v880_v6 = vrot.slane %v872_v37, 6 }
 0xae3   :  { %v883_v4 = vadd.f32 %v879_v36, %v1783_v39  ;;  %v875_v40 = vpop.f32.mrb[15].mxu0 }
 0xae4   :  { %v884_v8 = vadd.f32 %v880_v6, %v1785_v42  ;;  %v1055_v6 = vsub.f32 1.0, %v1319_v24 }
 0xae5   :  { %v1312_v0 = vmul.f32 -1.442695, %v883_v4 }
 0xae6   :  { %v1313_v55 = vmul.f32 -1.442695, %v884_v8 }
 0xae7   :  { %1425 = vpow2.f32 %v1312_v0 }
 0xae8   :  { %1427 = vtanh.f32 %v884_v8 }
 0xaf1   :  { %v1426_v41 = vpop.eup %1425 }
 0xaf2   :  { %v888_v10 = vadd.f32 1.0, %v1426_v41  ;;  %v1428_v43 = vpop.eup %1427 }
 0xaf4   :  { %1429 = vrcp.f32 %v888_v10 }
 0xaf5   :  { %1431 = vpow2.f32 %v1313_v55 }
 0xafe   :  { %v1430_v47 = vpop.eup %1429 }
 0xaff   :  { %v902_v48 = vmul.f32 %v1430_v47, %v1428_v43  ;;  %v901_v49 = vmul.f32 %v1430_v47, %v899_v45  ;;  %v1432_v56 = vpop.eup %1431 }
 0xb00   :  { %v895_v59 = vadd.f32 1.0, %v1432_v56 }
 0xb01   :  { %904 = vrot.lane.b32.xlu1 %v902_v48, %s1619_s2 }
 0xb02   :  { %1433 = vrcp.f32 %v895_v59 }
 0xb05   :  { %915 = vperm.xlu1 %1340, %v1314_v13  }
 0xb09   :  { %932 = vrot.lane.b32.xlu1 %v930_v50, %s1619_s2 }
 0xb0c   :  { %v1434_v62 = vpop.eup %1433 }
 0xb0d   :  { %944 = vrot.lane.b32.xlu1 %v942_v54, %s1619_s2 }
 0xb73   :  { %v905_v60 = vpop.permute.xlu1 %904 }
 0xb74   :  { %v907_v61 = vadd.f32 %v905_v60, %v901_v49 }
 0xb76   :  { %1435 = vtanh.f32 %v907_v61  ;;  %v937_v5 = vrot.slane %v907_v61, 2 }
 0xb80   :  { %v1436_v63 = vpop.eup %1435 }
 0xb81   :  { %v909_v1 = vmul.f32 %v1436_v63, %v1434_v62  ;;  %v1324_v62 = vsel %vm1164_vm8, 1.0, %v1618_v21 }
 0xb83   :  { %v919_v3 = vrot.slane %v909_v1, 2 }
 0xb84   :  { %v1918_v7 = vpop.permute.xlu1 %915 }
 0xb85   :  { %920 = vrot.lane.b32.xlu0 %v919_v3, %s1619_s2 }
 0xb88   :  { %v933_v9 = vpop.permute.xlu1 %932 }
 0xb89   :  { %938 = vrot.lane.b32.xlu0 %v937_v5, %s1619_s2 }
 0xb8c   :  { %v945_v22 = vpop.permute.xlu1 %944 }
 0xbf7   :  { %v921_v13 = vpop.permute.xlu0 %920 }
 0xbf8   :  { %v923_v15 = vmul.f32 %v921_v13, %v1918_v7 }
 0xbfa   :  { %v1921_v17 = vadd.f32 %v933_v9, %v923_v15 }
 0xbfb   :  { %v939_v18 = vpop.permute.xlu0 %938 }
 0xbfc   :  { %v961_v19 = vpack.c.bf16 %v1921_v17, %v1921_v17  ;;  %v941_v2 = vmul.f32 %v939_v18, %v1918_v7 }
 0xbfe   :  { %v947_v32 = vadd.f32 %v945_v22, %v941_v2  ;;  %1316 = vmatmul.mubr.msk.bf16.vlgmr.msra.gmra.mrb[12].mxu1 %vm142_vm0, %v961_v19  ;;  %v1290_v22 = vmul.f32 -1.442695, %v1793_v11  ;;  %v1305_v11 = vmul.f32 -1.442695, %v1874_v52 }
 0xc00   :  { %v1028_v23 = vrot.slane %v947_v32, 4 }
 0xc02   :  { %1029 = vrot.lane.b32.xlu0 %v1028_v23, %s1619_s2 }
 0xc06   :  { %1046 = vperm.xlu0 %1339, %v1319_v24   ;;  %v579_v24 = vmul.f32 %v1850_v58, %v1839_v46 }
 0xc74   :  { %v1030_v10 = vpop.permute.xlu0 %1029 }
 0xc85   :  { %v1935_v54 = vpop.permute.xlu0 %1046 }
 0xcd1   :  { %v999_v26 = vpop.f32.mrb[12].mxu1 }
 0xcd2   :  { %v1008_v27 = vrot.slane %v999_v26, 4  ;;  %v1001_v28 = vpop.f32.mrb[13].mxu1 }
 0xcd3   :  { %v1003_v29 = vpop.f32.mrb[14].mxu1  ;;  %v1009_v35 = vrot.slane %v1001_v28, 4 }
 0xcd4   :  { %v1012_v30 = vadd.f32 %v1008_v27, %v1783_v39  ;;  %v1004_v33 = vpop.f32.mrb[15].mxu1  ;;  %v1300_v29 = vmul.f32 -1.442695, %v579_v24 }
 0xcd5   :  { %v1013_v36 = vadd.f32 %v1009_v35, %v1785_v42 }
 0xcd6   :  { %v1317_v34 = vmul.f32 -1.442695, %v1012_v30 }
 0xcd7   :  { %v1318_v8 = vmul.f32 -1.442695, %v1013_v36 }
 0xcd8   :  { %1437 = vpow2.f32 %v1317_v34 }
 0xcd9   :  { %1439 = vtanh.f32 %v1013_v36 }
 0xce2   :  { %v1438_v37 = vpop.eup %1437 }
 0xce3   :  { %v1017_v38 = vadd.f32 1.0, %v1438_v37  ;;  %v1440_v4 = vpop.eup %1439 }
 0xce5   :  { %1441 = vrcp.f32 %v1017_v38 }
 0xce6   :  { %1443 = vpow2.f32 %v1318_v8  ;;  %v456_v8 = vmul.f32 %v1816_v57, %v1813_v53 }
 0xcef   :  { %v1442_v40 = vpop.eup %1441 }
 0xcf0   :  { %v1033_v0 = vmul.f32 %v1442_v40, %v1440_v4  ;;  %v1444_v41 = vpop.eup %1443  ;;  %v1032_v14 = vmul.f32 %v1442_v40, %v1030_v10  ;;  %v948_v10 = vmul.f32 %v1921_v17, %v1918_v7 }
 0xcf1   :  { %v1024_v12 = vadd.f32 1.0, %v1444_v41  ;;  %v1295_v41 = vmul.f32 -1.442695, %v456_v8 }
 0xcf2   :  { %1035 = vrot.lane.b32.xlu1 %v1033_v0, %s1619_s2 }
 0xcf3   :  { %1445 = vrcp.f32 %v1024_v12 }
 0xcf6   :  { %1058 = vperm.xlu1 %1340, %v1055_v6  }
 0xcfd   :  { %v1446_v47 = vpop.eup %1445 }
 0xd64   :  { %v1036_v16 = vpop.permute.xlu1 %1035 }
 0xd65   :  { %v1038_v43 = vadd.f32 %v1036_v16, %v1032_v14  ;;  %v1315_v14 = vmul.f32 -1.442695, %v948_v10 }
 0xd67   :  { %1447 = vtanh.f32 %v1038_v43  ;;  %v1064_v45 = vrot.slane %v1038_v43, 4 }
 0xd69   :  { %1065 = vrot.lane.b32.xlu1 %v1064_v45, %s1619_s2 }
 0xd71   :  { %v1448_v48 = vpop.eup %1447 }
 0xd72   :  { %v1040_v49 = vmul.f32 %v1448_v48, %v1446_v47 }
 0xd74   :  { %v1050_v51 = vrot.slane %v1040_v49, 4 }
 0xd75   :  { %v1059_v50 = vpop.permute.xlu1 %1058 }
 0xd76   :  { %1051 = vrot.lane.b32.xlu0 %v1050_v51, %s1619_s2  ;;  %v1069_v56 = vmul.f32 %v1059_v50, %v947_v32  ;;  %v1061_v1 = vmul.f32 %v1059_v50, %v1921_v17  ;;  %v816_v32 = vmul.f32 %v1895_v31, %v1892_v44 }
 0xd78   :  { %v1310_v26 = vmul.f32 -1.442695, %v816_v32 }
 0xddb   :  { %v1066_v55 = vpop.permute.xlu1 %1065 }
 0xddc   :  { %v1068_v59 = vmul.f32 %v1066_v55, %v1935_v54 }
 0xdde   :  { %v1070_v60 = vadd.f32 %v1069_v56, %v1068_v59 }
 0xde0   :  { %v1151_v61 = vrot.slane %v1070_v60, 2 }
 0xde2   :  { %1152 = vrot.lane.b32.xlu0 %v1151_v61, %s1619_s2 }
 0xde6   :  { %1169 = vperm.xlu0 %1339, %v1324_v62  }
 0xde8   :  { %v1052_v63 = vpop.permute.xlu0 %1051 }
 0xde9   :  { %v1054_v3 = vmul.f32 %v1052_v63, %v1935_v54 }
 0xdeb   :  { %v1943_v5 = vadd.f32 %v1061_v1, %v1054_v3 }
 0xded   :  { %v1084_v9 = vpack.c.bf16 %v1943_v5, %v1943_v5  ;;  %v1071_v12 = vmul.f32 %v1943_v5, %v1935_v54 }
 0xdef   :  { %1321 = vmatmul.mubr.msk.bf16.vlgmr.msra.gmra.mrb[16].mxu0 %vm142_vm0, %v1084_v9  ;;  %v1320_v43 = vmul.f32 -1.442695, %v1071_v12 }
 0xe54   :  { %v1153_v45 = vpop.permute.xlu0 %1152 }
 0xe65   :  { %v1170_v24 = vpop.permute.xlu0 %1169 }
 0xec2   :  { %v1122_v13 = vpop.f32.mrb[16].mxu0 }
 0xec3   :  { %v1131_v15 = vrot.slane %v1122_v13, 2  ;;  %v1124_v20 = vpop.f32.mrb[17].mxu0 }
 0xec4   :  { %v1126_v18 = vpop.f32.mrb[18].mxu0  ;;  %v1132_v23 = vrot.slane %v1124_v20, 2 }
 0xec5   :  { %v1135_v19 = vadd.f32 %v1131_v15, %v1783_v39  ;;  %v1127_v21 = vpop.f32.mrb[19].mxu0 }
 0xec6   :  { %v1136_v27 = vadd.f32 %v1132_v23, %v1785_v42  ;;  %v1178_v42 = vsub.f32 1.0, %v1324_v62 }
 0xec7   :  { %v1322_v2 = vmul.f32 -1.442695, %v1135_v19 }
 0xec8   :  { %v1323_v6 = vmul.f32 -1.442695, %v1136_v27 }
 0xec9   :  { %1449 = vpow2.f32 %v1322_v2 }
 0xeca   :  { %1451 = vpow2.f32 %v1290_v22 }
 0xecb   :  { %1453 = vpow2.f32 %v1310_v26 }
 0xecc   :  { %1455 = vtanh.f32 %v1136_v27 }
 0xed3   :  { %v1450_v28 = vpop.eup %1449 }
 0xed4   :  { %v1140_v39 = vadd.f32 1.0, %v1450_v28  ;;  %v1452_v30 = vpop.eup %1451 }
 0xed5   :  { %v328_v44 = vadd.f32 1.0, %v1452_v30  ;;  %v1454_v31 = vpop.eup %1453 }
 0xed6   :  { %1457 = vrcp.f32 %v1140_v39  ;;  %v1456_v33 = vpop.eup %1455  ;;  %v820_v46 = vadd.f32 1.0, %v1454_v31 }
 0xed7   :  { %1459 = vpow2.f32 %v1300_v29 }
 0xed8   :  { %1461 = vpow2.f32 %v1305_v11 }
 0xed9   :  { %1463 = vrcp.f32 %v328_v44 }
 0xeda   :  { %1465 = vrcp.f32 %v820_v46 }
 0xee0   :  { %v1458_v34 = vpop.eup %1457 }
 0xee1   :  { %v1460_v58 = vpop.eup %1459  ;;  %v1156_v35 = vmul.f32 %v1458_v34, %v1456_v33  ;;  %v1155_v48 = vmul.f32 %v1458_v34, %v1153_v45 }
 0xee2   :  { %v583_v36 = vadd.f32 1.0, %v1460_v58  ;;  %v1462_v37 = vpop.eup %1461 }
 0xee3   :  { %1158 = vrot.lane.b32.xlu1 %v1156_v35, %s1619_s2  ;;  %v706_v38 = vadd.f32 1.0, %v1462_v37  ;;  %v1464_v52 = vpop.eup %1463 }
 0xee4   :  { %1467 = vrcp.f32 %v583_v36  ;;  %v1466_v4 = vpop.eup %1465 }
 0xee5   :  { %1469 = vrcp.f32 %v706_v38 }
 0xee6   :  { %1471 = vpow2.f32 %v1323_v6 }
 0xee7   :  { %1181 = vperm.xlu1 %1340, %v1178_v42   ;;  %1473 = vpow2.f32 %v1295_v41  ;;  %v1622_v41 = vmov 1983009808  }
 0xee8   :  { %1475 = vpow2.f32 %v1315_v14  ;;  %v1244_v10 = vunpack.c.l.s4 %v1622_v41 }
 0xee9   :  { %1477 = vpow2.f32 %v1320_v43 }
 0xeea   :  { %v1245_v43 = vunpack.c.0.s8 %v1244_v10 }
 0xeeb   :  { %332 = vrot.lane.b32.xlu1 %v1464_v52, %s1620_s5 }
 0xeee   :  { %v1468_v40 = vpop.eup %1467 }
 0xeef   :  { %824 = vrot.lane.b32.xlu1 %v1466_v4, %s1620_s5  ;;  %v1470_v0 = vpop.eup %1469 }
 0xef0   :  { %v1472_v16 = vpop.eup %1471 }
 0xef1   :  { %v1147_v47 = vadd.f32 1.0, %v1472_v16  ;;  %v1474_v53 = vpop.eup %1473 }
 0xef2   :  { %v460_v57 = vadd.f32 1.0, %v1474_v53  ;;  %v1476_v50 = vpop.eup %1475 }
 0xef3   :  { %587 = vrot.lane.b32.xlu1 %v1468_v40, %s1620_s5  ;;  %1479 = vrcp.f32 %v1147_v47  ;;  %v1478_v7 = vpop.eup %1477  ;;  %v952_v17 = vadd.f32 1.0, %v1476_v50 }
 0xef4   :  { %v1075_v59 = vadd.f32 1.0, %v1478_v7 }
 0xef7   :  { %710 = vrot.lane.b32.xlu1 %v1470_v0, %s1620_s5 }
 0xefd   :  { %v1480_v54 = vpop.eup %1479 }
 0xf55   :  { %v1159_v49 = vpop.permute.xlu1 %1158 }
 0xf56   :  { %v1161_v51 = vadd.f32 %v1159_v49, %v1155_v48 }
 0xf58   :  { %1481 = vtanh.f32 %v1161_v51  ;;  %v1248_v51 = vsub.s32 %v1245_v43, %v1773_v25 }
 0xf59   :  { %1483 = vrcp.f32 %v460_v57 }
 0xf5a   :  { %1485 = vrcp.f32 %v952_v17  ;;  %v1239_v17 = vld [vmem:[#allocation2] sm:$0xf] }
 0xf5b   :  { %1487 = vrcp.f32 %v1075_v59 }
 0xf62   :  { %v1482_v55 = vpop.eup %1481 }
 0xf63   :  { %v1163_v56 = vmul.f32 %v1482_v55, %v1480_v54  ;;  %v1484_v62 = vpop.eup %1483 }
 0xf64   :  { %v1486_v9 = vpop.eup %1485 }
 0xf65   :  { %v1173_v60 = vrot.slane %v1163_v56, 6  ;;  %v1488_v18 = vpop.eup %1487 }
 0xf66   :  { %v1182_v61 = vpop.permute.xlu1 %1181 }
 0xf67   :  { %1174 = vrot.lane.b32.xlu0 %v1173_v60, %s1619_s2  ;;  %v1184_v27 = vmul.f32 %v1182_v61, %v1943_v5 }
 0xf6a   :  { %v333_v63 = vpop.permute.xlu1 %332 }
 0xf6b   :  { %v335_v1 = vadd.f32 %v1464_v52, %v333_v63  ;;  %464 = vrot.lane.b32.xlu0 %v1484_v62, %s1620_s5 }
 0xf6d   :  { %v336_v3 = vmul.f32 0.5, %v335_v1 }
 0xf6e   :  { %v825_v13 = vpop.permute.xlu1 %824 }
 0xf6f   :  { %v827_v15 = vadd.f32 %v1466_v4, %v825_v13  ;;  %956 = vrot.lane.b32.xlu0 %v1486_v9, %s1620_s5  ;;  %1200 = vrot.lane.b32.xlu1 %v336_v3, %s1619_s2 }
 0xf71   :  { %v828_v20 = vmul.f32 0.5, %v827_v15 }
 0xf72   :  { %v588_v19 = vpop.permute.xlu1 %587 }
 0xf73   :  { %v590_v21 = vadd.f32 %v1468_v40, %v588_v19  ;;  %1079 = vrot.lane.b32.xlu0 %v1488_v18, %s1620_s5  ;;  %1216 = vrot.lane.b32.xlu1 %v828_v20, %s1619_s2 }
 0xf75   :  { %v591_v2 = vmul.f32 0.5, %v590_v21 }
 0xf76   :  { %v711_v22 = vpop.permute.xlu1 %710 }
 0xf77   :  { %v713_v32 = vadd.f32 %v1470_v0, %v711_v22  ;;  %1208 = vrot.lane.b32.xlu1 %v591_v2, %s1619_s2 }
 0xf79   :  { %v714_v23 = vmul.f32 0.5, %v713_v32 }
 0xf7b   :  { %1212 = vrot.lane.b32.xlu1 %v714_v23, %s1620_s5 }
 0xfd9   :  { %v1175_v26 = vpop.permute.xlu0 %1174 }
 0xfda   :  { %v1177_v28 = vmul.f32 %v1175_v26, %v1170_v24 }
 0xfdc   :  { %v1185_v29 = vadd.f32 %v1184_v27, %v1177_v28 }
 0xfdd   :  { %v465_v31 = vpop.permute.xlu0 %464 }
 0xfde   :  { %v1186_v39 = vmul.f32 %v1185_v29, %v1170_v24  ;;  %v467_v34 = vadd.f32 %v1484_v62, %v465_v31 }
 0xfe0   :  { %v1325_v11 = vmul.f32 -1.442695, %v1186_v39  ;;  %v468_v58 = vmul.f32 0.5, %v467_v34 }
 0xfe1   :  { %v957_v33 = vpop.permute.xlu0 %956  ;;  %v1201_v40 = vpop.permute.xlu1 %1200 }
 0xfe2   :  { %1489 = vpow2.f32 %v1325_v11  ;;  %v959_v35 = vadd.f32 %v1486_v9, %v957_v33 }
 0xfe4   :  { %v960_v5 = vmul.f32 0.5, %v959_v35 }
 0xfe5   :  { %v1080_v42 = vpop.permute.xlu0 %1079  ;;  %v1217_v6 = vpop.permute.xlu1 %1216 }
 0xfe6   :  { %v1082_v36 = vadd.f32 %v1488_v18, %v1080_v42 }
 0xfe8   :  { %v1083_v37 = vmul.f32 0.5, %v1082_v36 }
 0xfe9   :  { %v1209_v12 = vpop.permute.xlu1 %1208 }
 0xfec   :  { %v1490_v30 = vpop.eup %1489 }
 0xfed   :  { %v1190_v44 = vadd.f32 1.0, %v1490_v30  ;;  %v1213_v48 = vpop.permute.xlu1 %1212 }
 0xfef   :  { %1491 = vrcp.f32 %v1190_v44 }
 0xff9   :  { %v1492_v46 = vpop.eup %1491 }
 0xffa   :  { %1194 = vrot.lane.b32.xlu0 %v1492_v46, %s1620_s5 }
 0xffe   :  { %1204 = vrot.lane.b32.xlu0 %v468_v58, %s1621_s22 }
0x1002   :  { %1220 = vrot.lane.b32.xlu0 %v960_v5, %s1621_s22 }
0x1006   :  { %1224 = vrot.lane.b32.xlu0 %v1083_v37, %s1619_s2 }
0x106c   :  { %v1195_v38 = vpop.permute.xlu0 %1194 }
0x106d   :  { %v1197_v52 = vadd.f32 %v1492_v46, %v1195_v38 }
0x106f   :  { %v1198_v4 = vmul.f32 0.5, %v1197_v52 }
0x1070   :  { %v1205_v0 = vpop.permute.xlu0 %1204 }
0x1071   :  { %1228 = vrot.lane.b32.xlu0 %v1198_v4, %s1620_s5  ;;  %v1232_v14 = vsel %vm1231_vm9, %v1201_v40, %v1205_v0 }
0x1072   :  { %v1233_v45 = vsel %vm142_vm0, %v1232_v14, %v1209_v12 }
0x1073   :  { %v1235_v57 = vsel %vm1234_vm10, %v1233_v45, %v1213_v48 }
0x1074   :  { %v1221_v8 = vpop.permute.xlu0 %1220 }
0x1075   :  { %v1236_v47 = vsel %vm1231_vm9, %v1217_v6, %v1221_v8 }
0x1078   :  { %v1225_v16 = vpop.permute.xlu0 %1224 }
0x1079   :  { %v1237_v49 = vsel %vm142_vm0, %v1236_v47, %v1225_v16 }
0x10e3   :  { %v1229_v53 = vpop.permute.xlu0 %1228 }
0x10e4   :  { %v1238_v50 = vsel %vm1234_vm10, %v1237_v49, %v1229_v53 }
0x10e5   :  { %v1242_v7 = vcombine.low %v1235_v57, %v1238_v50 }
0x10e7   :  { %v1249_v54 = vrot.slane %v1242_v7, %v1248_v51 }
0x10e9   :  { %v1251_v55 = vmul.f32 %v1249_v54, %v1239_v17 }
0x10eb   :  { %1252 = vst [vmem:[#allocation10] sm:$0xf] %v1251_v55 }
0x10ec   :  { %1592 = shalt.err (!%p1589_p8)
}
0x10ed   :  { %s1593_s28 = scalar_lea.hbm %s2000_s6, 64 }
0x10ee   :  { %p1594_p9 = scmp.ne.s32.totalorder %s2000_s6, %s1593_s28  ;;  %p1597_p10 = scmp.lt.u32.totalorder %s1593_s28, %s2000_s6 }
0x10f0   :  { %p1599_p11 = pnand %p1597_p10, %p1594_p9 }
0x10f2   :  { %1602 = shalt.err (!%p1599_p11)
}
0x10f3   :  { %1262 = dma.vmem_to_hbm [thread:$0]  %s1260_s24, 64, %s2000_s6, [#allocation4]  }
0x10f4   :  { %1609 = dma.done.wait [#allocation4], 64  }
0x10f5   :  { %1610 = vsyncadd [#allocation4], 4294967232 }
0x10f6   :  { %1266 = vsyncpa [#allocation3], 1 }
0x10f7   :  { %1267 = vsyncpa [#allocation6], 1 }
0x10f8   :  { %1268 = vsyncpa [#allocation9], 1 }
0x10f9   :  { %1269 = vsyncpa [#allocation4], 1 }

</bundles_post_ra>
